<compile_context>
chip_gen: v5e
topology: v5e:2x2
jax: 0.10.0
libtpu: 0.0.40
codegen_flags: <defaults>
</compile_context>

<pallas_src>
import jax
import jax.numpy as jnp
import numpy as np
from jax.experimental import pallas as pl
from jax.experimental.pallas import tpu as pltpu

image_size = (4, 28, 28)
BN_EPS = 1e-5

# Static per-layer config: (weight key, gamma key, beta key, in H(=W), K, stride, pad)
_LAYER_CFG = (
    ("w1", "g1", "b1", 1, 4, 1, 0),
    ("w2", "g2", "b2", 4, 3, 2, 1),
    ("w3", "g3", "b3", 7, 3, 2, 1),
    ("w4", None, None, 13, 4, 2, 0),
)


def _out_size(H, K, s, p):
    return (H - 1) * s - 2 * p + K


# --------------------------- constant preparation ----------------------------

def prepare_params(params, batch_n):
    """Precompute (once, outside jit) all constants the fused kernel needs.

    For each ConvTranspose2d(Cin, Cout, K, stride s, padding p) on an (H, W)
    input, with pe = K-1-p and the spatially flipped kernel wf:
      A  (K, N*Ho, N*H):      A[kh, n*Ho+oh, n*H+hi] = 1 iff tap kh reads input
                              row hi when producing output row oh.
      Wm (K, W*Cin, Wo*Cout): Wm[kh, wi*Cin+ci, ow*Cout+co] = wf[kh, kw, ci, co]
                              with kw = pe + s*wi - ow when 0 <= kw < K, else 0
                              (folds flip + W-dilation + W-padding).
      G  (Wo*Cout, Cout), Gt (Cout, Wo*Cout): per-channel group reduce /
                              broadcast matrices for the fused BatchNorm.
    """
    args = []
    for (wk, gk, bk, H, K, s, p) in _LAYER_CFG:
        wt = params[wk]                                   # (Cin, Cout, K, K)
        Cin, Cout = int(wt.shape[0]), int(wt.shape[1])
        W = H
        Ho, Wo = _out_size(H, K, s, p), _out_size(W, K, s, p)
        pe = K - 1 - p

        # Row-selection matrices (fold H dilation + padding; 0/1, exact).
        oh = np.arange(Ho)[None, :, None]
        hi = np.arange(H)[None, None, :]
        kh = np.arange(K)[:, None, None]
        A = (pe + s * hi - oh == kh).astype(np.float32)               # (K, Ho, H)
        A = np.stack([np.kron(np.eye(batch_n, dtype=np.float32), A[k])
                      for k in range(K)])                             # (K, N*Ho, N*H)

        # Width/channel contraction matrices (fold flip + W dilation + padding).
        wi = np.arange(W)[:, None, None]
        ow = np.arange(Wo)[None, :, None]
        kw = np.arange(K)[None, None, :]
        T = (pe + s * wi - ow == kw).astype(np.float32)               # (W, Wo, K)
        wf = jnp.transpose(wt[:, :, ::-1, ::-1], (2, 3, 0, 1))        # (K,K,Cin,Cout)
        Wm = jnp.einsum("wok,hkic->hwioc", jnp.asarray(T), wf.astype(jnp.float32))
        Wm = Wm.reshape(K, W * Cin, Wo * Cout)

        args += [jnp.asarray(A), Wm]

        if gk is not None:                                            # fused BN constants
            G = np.kron(np.ones((Wo, 1), np.float32),
                        np.eye(Cout, dtype=np.float32))               # (Wo*Cout, Cout)
            args += [jnp.asarray(G),
                     jnp.asarray(np.ascontiguousarray(G.T)),
                     params[gk].reshape(1, Cout).astype(jnp.float32),
                     params[bk].reshape(1, Cout).astype(jnp.float32)]
    return args


# --------------------------------- kernel ------------------------------------

def _generator_kernel(z_ref,
                      a1, w1, g1, gt1, gm1, bt1,
                      a2, w2, g2, gt2, gm2, bt2,
                      a3, w3, g3, gt3, gm3, bt3,
                      a4, w4,
                      o_ref):
    f32 = jnp.float32

    def conv_t(x, a_ref, w_ref):
        """Transposed conv in 2-D layout: sum_kh (A_kh @ x) @ W_kh."""
        K = a_ref.shape[0]
        acc = None
        for k in range(K):                       # static unroll, K <= 4
            rows = jnp.dot(a_ref[k], x, preferred_element_type=f32)
            term = jnp.dot(rows, w_ref[k], preferred_element_type=f32)
            acc = term if acc is None else acc + term
        return acc

    def bn_relu(y, g_ref, gt_ref, gamma_ref, beta_ref):
        """Training-mode BatchNorm (one-pass biased batch stats) + ReLU."""
        cout = g_ref.shape[1]
        inv_cnt = 1.0 / float(y.shape[0] * (g_ref.shape[0] // cout))   # 1/(N*Ho*Wo)
        s1 = jnp.sum(y, axis=0, keepdims=True)                         # (1, Wo*Cout)
        s2 = jnp.sum(y * y, axis=0, keepdims=True)
        mean = jnp.dot(s1, g_ref[...], preferred_element_type=f32) * inv_cnt
        ex2 = jnp.dot(s2, g_ref[...], preferred_element_type=f32) * inv_cnt
        var = ex2 - mean * mean
        scale = gamma_ref[...] * jax.lax.rsqrt(var + BN_EPS)           # (1, Cout)
        shift = beta_ref[...] - mean * scale
        scale_c = jnp.dot(scale, gt_ref[...], preferred_element_type=f32)
        shift_c = jnp.dot(shift, gt_ref[...], preferred_element_type=f32)
        return jnp.maximum(y * scale_c + shift_c, 0.0)

    x = z_ref[...]                                        # (N*1, 1*Cin0)
    x = bn_relu(conv_t(x, a1, w1), g1, gt1, gm1, bt1)     # (N*4,  4*32 = 128)
    x = bn_relu(conv_t(x, a2, w2), g2, gt2, gm2, bt2)     # (N*7,  7*16 = 112)
    x = bn_relu(conv_t(x, a3, w3), g3, gt3, gm3, bt3)     # (N*13, 13*8 = 104)
    x = conv_t(x, a4, w4)                                 # (N*28, 28*4 = 112)
    o_ref[...] = jax.nn.sigmoid(x)


# -------------------------------- wrapper ------------------------------------

def generator_forward(x_nchw, prep):
    """Reproduces Generator.forward.  x_nchw: (N, input_size, 1, 1)."""
    N = x_nchw.shape[0]
    C, Hout, Wout = image_size
    z2d = x_nchw.reshape(N, -1).astype(jnp.float32)       # latent; spatial is 1x1

    vspec = pl.BlockSpec(memory_space=pltpu.MemorySpace.VMEM)
    out2d = pl.pallas_call(
        _generator_kernel,
        out_shape=jax.ShapeDtypeStruct((N * Hout, Wout * C), jnp.float32),
        in_specs=[vspec] * (1 + len(prep)),
        out_specs=vspec,
    )(z2d, *prep)

    # rows = (n, oh), cols = (ow, c)  ->  NCHW
    out = out2d.reshape(N, Hout, Wout, C).transpose(0, 3, 1, 2)
    return out.reshape(-1, C, Hout, Wout)


# ---------------- pure-JAX reference (for correctness check) -----------------

def _conv_transpose_ref(x_nchw, w_t, stride, padding):
    K = w_t.shape[2]
    pe = K - 1 - padding
    w_conv = jnp.transpose(w_t[:, :, ::-1, ::-1], (1, 0, 2, 3))  # (Cout,Cin,K,K)
    return jax.lax.conv_general_dilated(
        x_nchw, w_conv, window_strides=(1, 1),
        padding=((pe, pe), (pe, pe)), lhs_dilation=(stride, stride),
        dimension_numbers=("NCHW", "OIHW", "NCHW"))


def _reference_forward(x, params):
    def bn_relu(y, g, b):
        mean = jnp.mean(y, axis=(0, 2, 3), keepdims=True)
        var = jnp.mean((y - mean) ** 2, axis=(0, 2, 3), keepdims=True)
        yhat = (y - mean) / jnp.sqrt(var + BN_EPS)
        return jnp.maximum(yhat * g.reshape(1, -1, 1, 1) + b.reshape(1, -1, 1, 1), 0.0)

    y = bn_relu(_conv_transpose_ref(x, params["w1"], 1, 0), params["g1"], params["b1"])
    y = bn_relu(_conv_transpose_ref(y, params["w2"], 2, 1), params["g2"], params["b2"])
    y = bn_relu(_conv_transpose_ref(y, params["w3"], 2, 1), params["g3"], params["b3"])
    y = _conv_transpose_ref(y, params["w4"], 2, 0)
    return jax.nn.sigmoid(y.reshape(-1, 4, 28, 28))


# ---------------------------------- main --------------------------------------

if __name__ == "__main__":
    input_size = 16  # latent dim (small)
    N = 2
    C = image_size[0]  # 4

    key = jax.random.PRNGKey(0)
    ks = jax.random.split(key, 12)

    # ConvTranspose2d weights are (in_channels, out_channels, KH, KW).
    params = {
        "w1": 0.1 * jax.random.normal(ks[0], (input_size, C * 8, 4, 4), jnp.float32),
        "w2": 0.1 * jax.random.normal(ks[1], (C * 8, C * 4, 3, 3), jnp.float32),
        "w3": 0.1 * jax.random.normal(ks[2], (C * 4, C * 2, 3, 3), jnp.float32),
        "w4": 0.1 * jax.random.normal(ks[3], (C * 2, C, 4, 4), jnp.float32),
        "g1": 1.0 + 0.1 * jax.random.normal(ks[4], (C * 8,), jnp.float32),
        "b1": 0.1 * jax.random.normal(ks[5], (C * 8,), jnp.float32),
        "g2": 1.0 + 0.1 * jax.random.normal(ks[6], (C * 4,), jnp.float32),
        "b2": 0.1 * jax.random.normal(ks[7], (C * 4,), jnp.float32),
        "g3": 1.0 + 0.1 * jax.random.normal(ks[8], (C * 2,), jnp.float32),
        "b3": 0.1 * jax.random.normal(ks[9], (C * 2,), jnp.float32),
    }
    # TODO(synk): nn.BatchNorm2d running-stat updates (a training side effect)
    # are not reproduced; normalization uses batch statistics as in train mode.

    x = jax.random.normal(ks[10], (N, input_size, 1, 1), jnp.float32)

    prep = prepare_params(params, N)          # weight transforms: once, outside jit
    fwd = jax.jit(generator_forward)
    out = jax.block_until_ready(fwd(x, prep))
    assert out.shape == (N, 4, 28, 28), out.shape

    ref = _reference_forward(x, params)
    np.testing.assert_allclose(np.asarray(out), np.asarray(ref), atol=3e-4, rtol=3e-4)

    print("KERNEL_OK")
</pallas_src>

<mosaic_0001>
module attributes {stable_mosaic.version = 11 : i64} {
  func.func @_generator_kernel(%arg0: memref<2x16xf32, #tpu.memory_space<vmem>>, %arg1: memref<4x8x2xf32, #tpu.memory_space<vmem>>, %arg2: memref<4x16x128xf32, #tpu.memory_space<vmem>>, %arg3: memref<128x32xf32, #tpu.memory_space<vmem>>, %arg4: memref<32x128xf32, #tpu.memory_space<vmem>>, %arg5: memref<1x32xf32, #tpu.memory_space<vmem>>, %arg6: memref<1x32xf32, #tpu.memory_space<vmem>>, %arg7: memref<3x14x8xf32, #tpu.memory_space<vmem>>, %arg8: memref<3x128x112xf32, #tpu.memory_space<vmem>>, %arg9: memref<112x16xf32, #tpu.memory_space<vmem>>, %arg10: memref<16x112xf32, #tpu.memory_space<vmem>>, %arg11: memref<1x16xf32, #tpu.memory_space<vmem>>, %arg12: memref<1x16xf32, #tpu.memory_space<vmem>>, %arg13: memref<3x26x14xf32, #tpu.memory_space<vmem>>, %arg14: memref<3x112x104xf32, #tpu.memory_space<vmem>>, %arg15: memref<104x8xf32, #tpu.memory_space<vmem>>, %arg16: memref<8x104xf32, #tpu.memory_space<vmem>>, %arg17: memref<1x8xf32, #tpu.memory_space<vmem>>, %arg18: memref<1x8xf32, #tpu.memory_space<vmem>>, %arg19: memref<4x56x26xf32, #tpu.memory_space<vmem>>, %arg20: memref<4x104x112xf32, #tpu.memory_space<vmem>>, %arg21: memref<56x112xf32, #tpu.memory_space<vmem>>) attributes {dimension_semantics = [], scalar_prefetch = 0 : i64, scratch_operands = 0 : i64, tpu.core_type = #tpu.core_type<tc>} {
    %c0 = arith.constant 0 : index
    %c0_0 = arith.constant 0 : index
    %0 = vector.load %arg0[%c0, %c0_0] : memref<2x16xf32, #tpu.memory_space<vmem>>, vector<2x16xf32>
    %c0_1 = arith.constant 0 : index
    %c0_2 = arith.constant 0 : index
    %c0_3 = arith.constant 0 : index
    %1 = vector.load %arg1[%c0_1, %c0_2, %c0_3] : memref<4x8x2xf32, #tpu.memory_space<vmem>>, vector<1x8x2xf32>
    %2 = vector.shape_cast %1 : vector<1x8x2xf32> to vector<8x2xf32>
    %cst = arith.constant dense<0.000000e+00> : vector<8x16xf32>
    %3 = tpu.matmul %2, %0, %cst {dimension_numbers = #tpu.dot_dimension_numbers<[1], [0], [0], [1], [0, 0, 1, 1], [], []>} : vector<8x2xf32>, vector<2x16xf32>, vector<8x16xf32> -> vector<8x16xf32>
    %c0_4 = arith.constant 0 : index
    %c0_5 = arith.constant 0 : index
    %c0_6 = arith.constant 0 : index
    %4 = vector.load %arg2[%c0_4, %c0_5, %c0_6] : memref<4x16x128xf32, #tpu.memory_space<vmem>>, vector<1x16x128xf32>
    %5 = vector.shape_cast %4 : vector<1x16x128xf32> to vector<16x128xf32>
    %cst_7 = arith.constant dense<0.000000e+00> : vector<8x128xf32>
    %6 = tpu.matmul %3, %5, %cst_7 {dimension_numbers = #tpu.dot_dimension_numbers<[1], [0], [0], [1], [0, 0, 1, 1], [], []>} : vector<8x16xf32>, vector<16x128xf32>, vector<8x128xf32> -> vector<8x128xf32>
    %c1 = arith.constant 1 : index
    %c0_8 = arith.constant 0 : index
    %c0_9 = arith.constant 0 : index
    %7 = vector.load %arg1[%c1, %c0_8, %c0_9] : memref<4x8x2xf32, #tpu.memory_space<vmem>>, vector<1x8x2xf32>
    %8 = vector.shape_cast %7 : vector<1x8x2xf32> to vector<8x2xf32>
    %cst_10 = arith.constant dense<0.000000e+00> : vector<8x16xf32>
    %9 = tpu.matmul %8, %0, %cst_10 {dimension_numbers = #tpu.dot_dimension_numbers<[1], [0], [0], [1], [0, 0, 1, 1], [], []>} : vector<8x2xf32>, vector<2x16xf32>, vector<8x16xf32> -> vector<8x16xf32>
    %c1_11 = arith.constant 1 : index
    %c0_12 = arith.constant 0 : index
    %c0_13 = arith.constant 0 : index
    %10 = vector.load %arg2[%c1_11, %c0_12, %c0_13] : memref<4x16x128xf32, #tpu.memory_space<vmem>>, vector<1x16x128xf32>
    %11 = vector.shape_cast %10 : vector<1x16x128xf32> to vector<16x128xf32>
    %cst_14 = arith.constant dense<0.000000e+00> : vector<8x128xf32>
    %12 = tpu.matmul %9, %11, %cst_14 {dimension_numbers = #tpu.dot_dimension_numbers<[1], [0], [0], [1], [0, 0, 1, 1], [], []>} : vector<8x16xf32>, vector<16x128xf32>, vector<8x128xf32> -> vector<8x128xf32>
    %13 = arith.addf %6, %12 : vector<8x128xf32>
    %c2 = arith.constant 2 : index
    %c0_15 = arith.constant 0 : index
    %c0_16 = arith.constant 0 : index
    %14 = vector.load %arg1[%c2, %c0_15, %c0_16] : memref<4x8x2xf32, #tpu.memory_space<vmem>>, vector<1x8x2xf32>
    %15 = vector.shape_cast %14 : vector<1x8x2xf32> to vector<8x2xf32>
    %cst_17 = arith.constant dense<0.000000e+00> : vector<8x16xf32>
    %16 = tpu.matmul %15, %0, %cst_17 {dimension_numbers = #tpu.dot_dimension_numbers<[1], [0], [0], [1], [0, 0, 1, 1], [], []>} : vector<8x2xf32>, vector<2x16xf32>, vector<8x16xf32> -> vector<8x16xf32>
    %c2_18 = arith.constant 2 : index
    %c0_19 = arith.constant 0 : index
    %c0_20 = arith.constant 0 : index
    %17 = vector.load %arg2[%c2_18, %c0_19, %c0_20] : memref<4x16x128xf32, #tpu.memory_space<vmem>>, vector<1x16x128xf32>
    %18 = vector.shape_cast %17 : vector<1x16x128xf32> to vector<16x128xf32>
    %cst_21 = arith.constant dense<0.000000e+00> : vector<8x128xf32>
    %19 = tpu.matmul %16, %18, %cst_21 {dimension_numbers = #tpu.dot_dimension_numbers<[1], [0], [0], [1], [0, 0, 1, 1], [], []>} : vector<8x16xf32>, vector<16x128xf32>, vector<8x128xf32> -> vector<8x128xf32>
    %20 = arith.addf %13, %19 : vector<8x128xf32>
    %c3 = arith.constant 3 : index
    %c0_22 = arith.constant 0 : index
    %c0_23 = arith.constant 0 : index
    %21 = vector.load %arg1[%c3, %c0_22, %c0_23] : memref<4x8x2xf32, #tpu.memory_space<vmem>>, vector<1x8x2xf32>
    %22 = vector.shape_cast %21 : vector<1x8x2xf32> to vector<8x2xf32>
    %cst_24 = arith.constant dense<0.000000e+00> : vector<8x16xf32>
    %23 = tpu.matmul %22, %0, %cst_24 {dimension_numbers = #tpu.dot_dimension_numbers<[1], [0], [0], [1], [0, 0, 1, 1], [], []>} : vector<8x2xf32>, vector<2x16xf32>, vector<8x16xf32> -> vector<8x16xf32>
    %c3_25 = arith.constant 3 : index
    %c0_26 = arith.constant 0 : index
    %c0_27 = arith.constant 0 : index
    %24 = vector.load %arg2[%c3_25, %c0_26, %c0_27] : memref<4x16x128xf32, #tpu.memory_space<vmem>>, vector<1x16x128xf32>
    %25 = vector.shape_cast %24 : vector<1x16x128xf32> to vector<16x128xf32>
    %cst_28 = arith.constant dense<0.000000e+00> : vector<8x128xf32>
    %26 = tpu.matmul %23, %25, %cst_28 {dimension_numbers = #tpu.dot_dimension_numbers<[1], [0], [0], [1], [0, 0, 1, 1], [], []>} : vector<8x16xf32>, vector<16x128xf32>, vector<8x128xf32> -> vector<8x128xf32>
    %27 = arith.addf %20, %26 : vector<8x128xf32>
    %cst_29 = arith.constant dense<0.000000e+00> : vector<128xf32>
    %28 = vector.multi_reduction <add>, %27, %cst_29 [0] : vector<8x128xf32> to vector<128xf32>
    %29 = vector.shape_cast %28 : vector<128xf32> to vector<1x128xf32>
    %30 = arith.mulf %27, %27 : vector<8x128xf32>
    %cst_30 = arith.constant dense<0.000000e+00> : vector<128xf32>
    %31 = vector.multi_reduction <add>, %30, %cst_30 [0] : vector<8x128xf32> to vector<128xf32>
    %32 = vector.shape_cast %31 : vector<128xf32> to vector<1x128xf32>
    %c0_31 = arith.constant 0 : index
    %c0_32 = arith.constant 0 : index
    %33 = vector.load %arg3[%c0_31, %c0_32] : memref<128x32xf32, #tpu.memory_space<vmem>>, vector<128x32xf32>
    %cst_33 = arith.constant dense<0.000000e+00> : vector<1x32xf32>
    %34 = tpu.matmul %29, %33, %cst_33 {dimension_numbers = #tpu.dot_dimension_numbers<[1], [0], [0], [1], [0, 0, 1, 1], [], []>} : vector<1x128xf32>, vector<128x32xf32>, vector<1x32xf32> -> vector<1x32xf32>
    %cst_34 = arith.constant 3.125000e-02 : f32
    %35 = vector.broadcast %cst_34 : f32 to vector<1x32xf32>
    %36 = arith.mulf %34, %35 : vector<1x32xf32>
    %c0_35 = arith.constant 0 : index
    %c0_36 = arith.constant 0 : index
    %37 = vector.load %arg3[%c0_35, %c0_36] : memref<128x32xf32, #tpu.memory_space<vmem>>, vector<128x32xf32>
    %cst_37 = arith.constant dense<0.000000e+00> : vector<1x32xf32>
    %38 = tpu.matmul %32, %37, %cst_37 {dimension_numbers = #tpu.dot_dimension_numbers<[1], [0], [0], [1], [0, 0, 1, 1], [], []>} : vector<1x128xf32>, vector<128x32xf32>, vector<1x32xf32> -> vector<1x32xf32>
    %cst_38 = arith.constant 3.125000e-02 : f32
    %39 = vector.broadcast %cst_38 : f32 to vector<1x32xf32>
    %40 = arith.mulf %38, %39 : vector<1x32xf32>
    %41 = arith.mulf %36, %36 : vector<1x32xf32>
    %42 = arith.subf %40, %41 : vector<1x32xf32>
    %c0_39 = arith.constant 0 : index
    %c0_40 = arith.constant 0 : index
    %43 = vector.load %arg5[%c0_39, %c0_40] : memref<1x32xf32, #tpu.memory_space<vmem>>, vector<1x32xf32>
    %cst_41 = arith.constant 9.99999974E-6 : f32
    %44 = vector.broadcast %cst_41 : f32 to vector<1x32xf32>
    %45 = arith.addf %42, %44 : vector<1x32xf32>
    %46 = math.rsqrt %45 : vector<1x32xf32>
    %47 = arith.mulf %43, %46 : vector<1x32xf32>
    %c0_42 = arith.constant 0 : index
    %c0_43 = arith.constant 0 : index
    %48 = vector.load %arg6[%c0_42, %c0_43] : memref<1x32xf32, #tpu.memory_space<vmem>>, vector<1x32xf32>
    %49 = arith.mulf %36, %47 : vector<1x32xf32>
    %50 = arith.subf %48, %49 : vector<1x32xf32>
    %c0_44 = arith.constant 0 : index
    %c0_45 = arith.constant 0 : index
    %51 = vector.load %arg4[%c0_44, %c0_45] : memref<32x128xf32, #tpu.memory_space<vmem>>, vector<32x128xf32>
    %cst_46 = arith.constant dense<0.000000e+00> : vector<1x128xf32>
    %52 = tpu.matmul %47, %51, %cst_46 {dimension_numbers = #tpu.dot_dimension_numbers<[1], [0], [0], [1], [0, 0, 1, 1], [], []>} : vector<1x32xf32>, vector<32x128xf32>, vector<1x128xf32> -> vector<1x128xf32>
    %c0_47 = arith.constant 0 : index
    %c0_48 = arith.constant 0 : index
    %53 = vector.load %arg4[%c0_47, %c0_48] : memref<32x128xf32, #tpu.memory_space<vmem>>, vector<32x128xf32>
    %cst_49 = arith.constant dense<0.000000e+00> : vector<1x128xf32>
    %54 = tpu.matmul %50, %53, %cst_49 {dimension_numbers = #tpu.dot_dimension_numbers<[1], [0], [0], [1], [0, 0, 1, 1], [], []>} : vector<1x32xf32>, vector<32x128xf32>, vector<1x128xf32> -> vector<1x128xf32>
    %55 = vector.broadcast %52 : vector<1x128xf32> to vector<8x128xf32>
    %56 = arith.mulf %27, %55 : vector<8x128xf32>
    %57 = vector.broadcast %54 : vector<1x128xf32> to vector<8x128xf32>
    %58 = arith.addf %56, %57 : vector<8x128xf32>
    %cst_50 = arith.constant 0.000000e+00 : f32
    %59 = vector.broadcast %cst_50 : f32 to vector<8x128xf32>
    %60 = arith.maximumf %58, %59 : vector<8x128xf32>
    %c0_51 = arith.constant 0 : index
    %c0_52 = arith.constant 0 : index
    %c0_53 = arith.constant 0 : index
    %61 = vector.load %arg7[%c0_51, %c0_52, %c0_53] : memref<3x14x8xf32, #tpu.memory_space<vmem>>, vector<1x14x8xf32>
    %62 = vector.shape_cast %61 : vector<1x14x8xf32> to vector<14x8xf32>
    %cst_54 = arith.constant dense<0.000000e+00> : vector<14x128xf32>
    %63 = tpu.matmul %62, %60, %cst_54 {dimension_numbers = #tpu.dot_dimension_numbers<[1], [0], [0], [1], [0, 0, 1, 1], [], []>} : vector<14x8xf32>, vector<8x128xf32>, vector<14x128xf32> -> vector<14x128xf32>
    %c0_55 = arith.constant 0 : index
    %c0_56 = arith.constant 0 : index
    %c0_57 = arith.constant 0 : index
    %64 = vector.load %arg8[%c0_55, %c0_56, %c0_57] : memref<3x128x112xf32, #tpu.memory_space<vmem>>, vector<1x128x112xf32>
    %65 = vector.shape_cast %64 : vector<1x128x112xf32> to vector<128x112xf32>
    %cst_58 = arith.constant dense<0.000000e+00> : vector<14x112xf32>
    %66 = tpu.matmul %63, %65, %cst_58 {dimension_numbers = #tpu.dot_dimension_numbers<[1], [0], [0], [1], [0, 0, 1, 1], [], []>} : vector<14x128xf32>, vector<128x112xf32>, vector<14x112xf32> -> vector<14x112xf32>
    %c1_59 = arith.constant 1 : index
    %c0_60 = arith.constant 0 : index
    %c0_61 = arith.constant 0 : index
    %67 = vector.load %arg7[%c1_59, %c0_60, %c0_61] : memref<3x14x8xf32, #tpu.memory_space<vmem>>, vector<1x14x8xf32>
    %68 = vector.shape_cast %67 : vector<1x14x8xf32> to vector<14x8xf32>
    %cst_62 = arith.constant dense<0.000000e+00> : vector<14x128xf32>
    %69 = tpu.matmul %68, %60, %cst_62 {dimension_numbers = #tpu.dot_dimension_numbers<[1], [0], [0], [1], [0, 0, 1, 1], [], []>} : vector<14x8xf32>, vector<8x128xf32>, vector<14x128xf32> -> vector<14x128xf32>
    %c1_63 = arith.constant 1 : index
    %c0_64 = arith.constant 0 : index
    %c0_65 = arith.constant 0 : index
    %70 = vector.load %arg8[%c1_63, %c0_64, %c0_65] : memref<3x128x112xf32, #tpu.memory_space<vmem>>, vector<1x128x112xf32>
    %71 = vector.shape_cast %70 : vector<1x128x112xf32> to vector<128x112xf32>
    %cst_66 = arith.constant dense<0.000000e+00> : vector<14x112xf32>
    %72 = tpu.matmul %69, %71, %cst_66 {dimension_numbers = #tpu.dot_dimension_numbers<[1], [0], [0], [1], [0, 0, 1, 1], [], []>} : vector<14x128xf32>, vector<128x112xf32>, vector<14x112xf32> -> vector<14x112xf32>
    %73 = arith.addf %66, %72 : vector<14x112xf32>
    %c2_67 = arith.constant 2 : index
    %c0_68 = arith.constant 0 : index
    %c0_69 = arith.constant 0 : index
    %74 = vector.load %arg7[%c2_67, %c0_68, %c0_69] : memref<3x14x8xf32, #tpu.memory_space<vmem>>, vector<1x14x8xf32>
    %75 = vector.shape_cast %74 : vector<1x14x8xf32> to vector<14x8xf32>
    %cst_70 = arith.constant dense<0.000000e+00> : vector<14x128xf32>
    %76 = tpu.matmul %75, %60, %cst_70 {dimension_numbers = #tpu.dot_dimension_numbers<[1], [0], [0], [1], [0, 0, 1, 1], [], []>} : vector<14x8xf32>, vector<8x128xf32>, vector<14x128xf32> -> vector<14x128xf32>
    %c2_71 = arith.constant 2 : index
    %c0_72 = arith.constant 0 : index
    %c0_73 = arith.constant 0 : index
    %77 = vector.load %arg8[%c2_71, %c0_72, %c0_73] : memref<3x128x112xf32, #tpu.memory_space<vmem>>, vector<1x128x112xf32>
    %78 = vector.shape_cast %77 : vector<1x128x112xf32> to vector<128x112xf32>
    %cst_74 = arith.constant dense<0.000000e+00> : vector<14x112xf32>
    %79 = tpu.matmul %76, %78, %cst_74 {dimension_numbers = #tpu.dot_dimension_numbers<[1], [0], [0], [1], [0, 0, 1, 1], [], []>} : vector<14x128xf32>, vector<128x112xf32>, vector<14x112xf32> -> vector<14x112xf32>
    %80 = arith.addf %73, %79 : vector<14x112xf32>
    %cst_75 = arith.constant dense<0.000000e+00> : vector<112xf32>
    %81 = vector.multi_reduction <add>, %80, %cst_75 [0] : vector<14x112xf32> to vector<112xf32>
    %82 = vector.shape_cast %81 : vector<112xf32> to vector<1x112xf32>
    %83 = arith.mulf %80, %80 : vector<14x112xf32>
    %cst_76 = arith.constant dense<0.000000e+00> : vector<112xf32>
    %84 = vector.multi_reduction <add>, %83, %cst_76 [0] : vector<14x112xf32> to vector<112xf32>
    %85 = vector.shape_cast %84 : vector<112xf32> to vector<1x112xf32>
    %c0_77 = arith.constant 0 : index
    %c0_78 = arith.constant 0 : index
    %86 = vector.load %arg9[%c0_77, %c0_78] : memref<112x16xf32, #tpu.memory_space<vmem>>, vector<112x16xf32>
    %cst_79 = arith.constant dense<0.000000e+00> : vector<1x16xf32>
    %87 = tpu.matmul %82, %86, %cst_79 {dimension_numbers = #tpu.dot_dimension_numbers<[1], [0], [0], [1], [0, 0, 1, 1], [], []>} : vector<1x112xf32>, vector<112x16xf32>, vector<1x16xf32> -> vector<1x16xf32>
    %cst_80 = arith.constant 0.0102040814 : f32
    %88 = vector.broadcast %cst_80 : f32 to vector<1x16xf32>
    %89 = arith.mulf %87, %88 : vector<1x16xf32>
    %c0_81 = arith.constant 0 : index
    %c0_82 = arith.constant 0 : index
    %90 = vector.load %arg9[%c0_81, %c0_82] : memref<112x16xf32, #tpu.memory_space<vmem>>, vector<112x16xf32>
    %cst_83 = arith.constant dense<0.000000e+00> : vector<1x16xf32>
    %91 = tpu.matmul %85, %90, %cst_83 {dimension_numbers = #tpu.dot_dimension_numbers<[1], [0], [0], [1], [0, 0, 1, 1], [], []>} : vector<1x112xf32>, vector<112x16xf32>, vector<1x16xf32> -> vector<1x16xf32>
    %cst_84 = arith.constant 0.0102040814 : f32
    %92 = vector.broadcast %cst_84 : f32 to vector<1x16xf32>
    %93 = arith.mulf %91, %92 : vector<1x16xf32>
    %94 = arith.mulf %89, %89 : vector<1x16xf32>
    %95 = arith.subf %93, %94 : vector<1x16xf32>
    %c0_85 = arith.constant 0 : index
    %c0_86 = arith.constant 0 : index
    %96 = vector.load %arg11[%c0_85, %c0_86] : memref<1x16xf32, #tpu.memory_space<vmem>>, vector<1x16xf32>
    %cst_87 = arith.constant 9.99999974E-6 : f32
    %97 = vector.broadcast %cst_87 : f32 to vector<1x16xf32>
    %98 = arith.addf %95, %97 : vector<1x16xf32>
    %99 = math.rsqrt %98 : vector<1x16xf32>
    %100 = arith.mulf %96, %99 : vector<1x16xf32>
    %c0_88 = arith.constant 0 : index
    %c0_89 = arith.constant 0 : index
    %101 = vector.load %arg12[%c0_88, %c0_89] : memref<1x16xf32, #tpu.memory_space<vmem>>, vector<1x16xf32>
    %102 = arith.mulf %89, %100 : vector<1x16xf32>
    %103 = arith.subf %101, %102 : vector<1x16xf32>
    %c0_90 = arith.constant 0 : index
    %c0_91 = arith.constant 0 : index
    %104 = vector.load %arg10[%c0_90, %c0_91] : memref<16x112xf32, #tpu.memory_space<vmem>>, vector<16x112xf32>
    %cst_92 = arith.constant dense<0.000000e+00> : vector<1x112xf32>
    %105 = tpu.matmul %100, %104, %cst_92 {dimension_numbers = #tpu.dot_dimension_numbers<[1], [0], [0], [1], [0, 0, 1, 1], [], []>} : vector<1x16xf32>, vector<16x112xf32>, vector<1x112xf32> -> vector<1x112xf32>
    %c0_93 = arith.constant 0 : index
    %c0_94 = arith.constant 0 : index
    %106 = vector.load %arg10[%c0_93, %c0_94] : memref<16x112xf32, #tpu.memory_space<vmem>>, vector<16x112xf32>
    %cst_95 = arith.constant dense<0.000000e+00> : vector<1x112xf32>
    %107 = tpu.matmul %103, %106, %cst_95 {dimension_numbers = #tpu.dot_dimension_numbers<[1], [0], [0], [1], [0, 0, 1, 1], [], []>} : vector<1x16xf32>, vector<16x112xf32>, vector<1x112xf32> -> vector<1x112xf32>
    %108 = vector.broadcast %105 : vector<1x112xf32> to vector<14x112xf32>
    %109 = arith.mulf %80, %108 : vector<14x112xf32>
    %110 = vector.broadcast %107 : vector<1x112xf32> to vector<14x112xf32>
    %111 = arith.addf %109, %110 : vector<14x112xf32>
    %cst_96 = arith.constant 0.000000e+00 : f32
    %112 = vector.broadcast %cst_96 : f32 to vector<14x112xf32>
    %113 = arith.maximumf %111, %112 : vector<14x112xf32>
    %c0_97 = arith.constant 0 : index
    %c0_98 = arith.constant 0 : index
    %c0_99 = arith.constant 0 : index
    %114 = vector.load %arg13[%c0_97, %c0_98, %c0_99] : memref<3x26x14xf32, #tpu.memory_space<vmem>>, vector<1x26x14xf32>
    %115 = vector.shape_cast %114 : vector<1x26x14xf32> to vector<26x14xf32>
    %cst_100 = arith.constant dense<0.000000e+00> : vector<26x112xf32>
    %116 = tpu.matmul %115, %113, %cst_100 {dimension_numbers = #tpu.dot_dimension_numbers<[1], [0], [0], [1], [0, 0, 1, 1], [], []>} : vector<26x14xf32>, vector<14x112xf32>, vector<26x112xf32> -> vector<26x112xf32>
    %c0_101 = arith.constant 0 : index
    %c0_102 = arith.constant 0 : index
    %c0_103 = arith.constant 0 : index
    %117 = vector.load %arg14[%c0_101, %c0_102, %c0_103] : memref<3x112x104xf32, #tpu.memory_space<vmem>>, vector<1x112x104xf32>
    %118 = vector.shape_cast %117 : vector<1x112x104xf32> to vector<112x104xf32>
    %cst_104 = arith.constant dense<0.000000e+00> : vector<26x104xf32>
    %119 = tpu.matmul %116, %118, %cst_104 {dimension_numbers = #tpu.dot_dimension_numbers<[1], [0], [0], [1], [0, 0, 1, 1], [], []>} : vector<26x112xf32>, vector<112x104xf32>, vector<26x104xf32> -> vector<26x104xf32>
    %c1_105 = arith.constant 1 : index
    %c0_106 = arith.constant 0 : index
    %c0_107 = arith.constant 0 : index
    %120 = vector.load %arg13[%c1_105, %c0_106, %c0_107] : memref<3x26x14xf32, #tpu.memory_space<vmem>>, vector<1x26x14xf32>
    %121 = vector.shape_cast %120 : vector<1x26x14xf32> to vector<26x14xf32>
    %cst_108 = arith.constant dense<0.000000e+00> : vector<26x112xf32>
    %122 = tpu.matmul %121, %113, %cst_108 {dimension_numbers = #tpu.dot_dimension_numbers<[1], [0], [0], [1], [0, 0, 1, 1], [], []>} : vector<26x14xf32>, vector<14x112xf32>, vector<26x112xf32> -> vector<26x112xf32>
    %c1_109 = arith.constant 1 : index
    %c0_110 = arith.constant 0 : index
    %c0_111 = arith.constant 0 : index
    %123 = vector.load %arg14[%c1_109, %c0_110, %c0_111] : memref<3x112x104xf32, #tpu.memory_space<vmem>>, vector<1x112x104xf32>
    %124 = vector.shape_cast %123 : vector<1x112x104xf32> to vector<112x104xf32>
    %cst_112 = arith.constant dense<0.000000e+00> : vector<26x104xf32>
    %125 = tpu.matmul %122, %124, %cst_112 {dimension_numbers = #tpu.dot_dimension_numbers<[1], [0], [0], [1], [0, 0, 1, 1], [], []>} : vector<26x112xf32>, vector<112x104xf32>, vector<26x104xf32> -> vector<26x104xf32>
    %126 = arith.addf %119, %125 : vector<26x104xf32>
    %c2_113 = arith.constant 2 : index
    %c0_114 = arith.constant 0 : index
    %c0_115 = arith.constant 0 : index
    %127 = vector.load %arg13[%c2_113, %c0_114, %c0_115] : memref<3x26x14xf32, #tpu.memory_space<vmem>>, vector<1x26x14xf32>
    %128 = vector.shape_cast %127 : vector<1x26x14xf32> to vector<26x14xf32>
    %cst_116 = arith.constant dense<0.000000e+00> : vector<26x112xf32>
    %129 = tpu.matmul %128, %113, %cst_116 {dimension_numbers = #tpu.dot_dimension_numbers<[1], [0], [0], [1], [0, 0, 1, 1], [], []>} : vector<26x14xf32>, vector<14x112xf32>, vector<26x112xf32> -> vector<26x112xf32>
    %c2_117 = arith.constant 2 : index
    %c0_118 = arith.constant 0 : index
    %c0_119 = arith.constant 0 : index
    %130 = vector.load %arg14[%c2_117, %c0_118, %c0_119] : memref<3x112x104xf32, #tpu.memory_space<vmem>>, vector<1x112x104xf32>
    %131 = vector.shape_cast %130 : vector<1x112x104xf32> to vector<112x104xf32>
    %cst_120 = arith.constant dense<0.000000e+00> : vector<26x104xf32>
    %132 = tpu.matmul %129, %131, %cst_120 {dimension_numbers = #tpu.dot_dimension_numbers<[1], [0], [0], [1], [0, 0, 1, 1], [], []>} : vector<26x112xf32>, vector<112x104xf32>, vector<26x104xf32> -> vector<26x104xf32>
    %133 = arith.addf %126, %132 : vector<26x104xf32>
    %cst_121 = arith.constant dense<0.000000e+00> : vector<104xf32>
    %134 = vector.multi_reduction <add>, %133, %cst_121 [0] : vector<26x104xf32> to vector<104xf32>
    %135 = vector.shape_cast %134 : vector<104xf32> to vector<1x104xf32>
    %136 = arith.mulf %133, %133 : vector<26x104xf32>
    %cst_122 = arith.constant dense<0.000000e+00> : vector<104xf32>
    %137 = vector.multi_reduction <add>, %136, %cst_122 [0] : vector<26x104xf32> to vector<104xf32>
    %138 = vector.shape_cast %137 : vector<104xf32> to vector<1x104xf32>
    %c0_123 = arith.constant 0 : index
    %c0_124 = arith.constant 0 : index
    %139 = vector.load %arg15[%c0_123, %c0_124] : memref<104x8xf32, #tpu.memory_space<vmem>>, vector<104x8xf32>
    %cst_125 = arith.constant dense<0.000000e+00> : vector<1x8xf32>
    %140 = tpu.matmul %135, %139, %cst_125 {dimension_numbers = #tpu.dot_dimension_numbers<[1], [0], [0], [1], [0, 0, 1, 1], [], []>} : vector<1x104xf32>, vector<104x8xf32>, vector<1x8xf32> -> vector<1x8xf32>
    %cst_126 = arith.constant 2.958580e-03 : f32
    %141 = vector.broadcast %cst_126 : f32 to vector<1x8xf32>
    %142 = arith.mulf %140, %141 : vector<1x8xf32>
    %c0_127 = arith.constant 0 : index
    %c0_128 = arith.constant 0 : index
    %143 = vector.load %arg15[%c0_127, %c0_128] : memref<104x8xf32, #tpu.memory_space<vmem>>, vector<104x8xf32>
    %cst_129 = arith.constant dense<0.000000e+00> : vector<1x8xf32>
    %144 = tpu.matmul %138, %143, %cst_129 {dimension_numbers = #tpu.dot_dimension_numbers<[1], [0], [0], [1], [0, 0, 1, 1], [], []>} : vector<1x104xf32>, vector<104x8xf32>, vector<1x8xf32> -> vector<1x8xf32>
    %cst_130 = arith.constant 2.958580e-03 : f32
    %145 = vector.broadcast %cst_130 : f32 to vector<1x8xf32>
    %146 = arith.mulf %144, %145 : vector<1x8xf32>
    %147 = arith.mulf %142, %142 : vector<1x8xf32>
    %148 = arith.subf %146, %147 : vector<1x8xf32>
    %c0_131 = arith.constant 0 : index
    %c0_132 = arith.constant 0 : index
    %149 = vector.load %arg17[%c0_131, %c0_132] : memref<1x8xf32, #tpu.memory_space<vmem>>, vector<1x8xf32>
    %cst_133 = arith.constant 9.99999974E-6 : f32
    %150 = vector.broadcast %cst_133 : f32 to vector<1x8xf32>
    %151 = arith.addf %148, %150 : vector<1x8xf32>
    %152 = math.rsqrt %151 : vector<1x8xf32>
    %153 = arith.mulf %149, %152 : vector<1x8xf32>
    %c0_134 = arith.constant 0 : index
    %c0_135 = arith.constant 0 : index
    %154 = vector.load %arg18[%c0_134, %c0_135] : memref<1x8xf32, #tpu.memory_space<vmem>>, vector<1x8xf32>
    %155 = arith.mulf %142, %153 : vector<1x8xf32>
    %156 = arith.subf %154, %155 : vector<1x8xf32>
    %c0_136 = arith.constant 0 : index
    %c0_137 = arith.constant 0 : index
    %157 = vector.load %arg16[%c0_136, %c0_137] : memref<8x104xf32, #tpu.memory_space<vmem>>, vector<8x104xf32>
    %cst_138 = arith.constant dense<0.000000e+00> : vector<1x104xf32>
    %158 = tpu.matmul %153, %157, %cst_138 {dimension_numbers = #tpu.dot_dimension_numbers<[1], [0], [0], [1], [0, 0, 1, 1], [], []>} : vector<1x8xf32>, vector<8x104xf32>, vector<1x104xf32> -> vector<1x104xf32>
    %c0_139 = arith.constant 0 : index
    %c0_140 = arith.constant 0 : index
    %159 = vector.load %arg16[%c0_139, %c0_140] : memref<8x104xf32, #tpu.memory_space<vmem>>, vector<8x104xf32>
    %cst_141 = arith.constant dense<0.000000e+00> : vector<1x104xf32>
    %160 = tpu.matmul %156, %159, %cst_141 {dimension_numbers = #tpu.dot_dimension_numbers<[1], [0], [0], [1], [0, 0, 1, 1], [], []>} : vector<1x8xf32>, vector<8x104xf32>, vector<1x104xf32> -> vector<1x104xf32>
    %161 = vector.broadcast %158 : vector<1x104xf32> to vector<26x104xf32>
    %162 = arith.mulf %133, %161 : vector<26x104xf32>
    %163 = vector.broadcast %160 : vector<1x104xf32> to vector<26x104xf32>
    %164 = arith.addf %162, %163 : vector<26x104xf32>
    %cst_142 = arith.constant 0.000000e+00 : f32
    %165 = vector.broadcast %cst_142 : f32 to vector<26x104xf32>
    %166 = arith.maximumf %164, %165 : vector<26x104xf32>
    %c0_143 = arith.constant 0 : index
    %c0_144 = arith.constant 0 : index
    %c0_145 = arith.constant 0 : index
    %167 = vector.load %arg19[%c0_143, %c0_144, %c0_145] : memref<4x56x26xf32, #tpu.memory_space<vmem>>, vector<1x56x26xf32>
    %168 = vector.shape_cast %167 : vector<1x56x26xf32> to vector<56x26xf32>
    %cst_146 = arith.constant dense<0.000000e+00> : vector<56x104xf32>
    %169 = tpu.matmul %168, %166, %cst_146 {dimension_numbers = #tpu.dot_dimension_numbers<[1], [0], [0], [1], [0, 0, 1, 1], [], []>} : vector<56x26xf32>, vector<26x104xf32>, vector<56x104xf32> -> vector<56x104xf32>
    %c0_147 = arith.constant 0 : index
    %c0_148 = arith.constant 0 : index
    %c0_149 = arith.constant 0 : index
    %170 = vector.load %arg20[%c0_147, %c0_148, %c0_149] : memref<4x104x112xf32, #tpu.memory_space<vmem>>, vector<1x104x112xf32>
    %171 = vector.shape_cast %170 : vector<1x104x112xf32> to vector<104x112xf32>
    %cst_150 = arith.constant dense<0.000000e+00> : vector<56x112xf32>
    %172 = tpu.matmul %169, %171, %cst_150 {dimension_numbers = #tpu.dot_dimension_numbers<[1], [0], [0], [1], [0, 0, 1, 1], [], []>} : vector<56x104xf32>, vector<104x112xf32>, vector<56x112xf32> -> vector<56x112xf32>
    %c1_151 = arith.constant 1 : index
    %c0_152 = arith.constant 0 : index
    %c0_153 = arith.constant 0 : index
    %173 = vector.load %arg19[%c1_151, %c0_152, %c0_153] : memref<4x56x26xf32, #tpu.memory_space<vmem>>, vector<1x56x26xf32>
    %174 = vector.shape_cast %173 : vector<1x56x26xf32> to vector<56x26xf32>
    %cst_154 = arith.constant dense<0.000000e+00> : vector<56x104xf32>
    %175 = tpu.matmul %174, %166, %cst_154 {dimension_numbers = #tpu.dot_dimension_numbers<[1], [0], [0], [1], [0, 0, 1, 1], [], []>} : vector<56x26xf32>, vector<26x104xf32>, vector<56x104xf32> -> vector<56x104xf32>
    %c1_155 = arith.constant 1 : index
    %c0_156 = arith.constant 0 : index
    %c0_157 = arith.constant 0 : index
    %176 = vector.load %arg20[%c1_155, %c0_156, %c0_157] : memref<4x104x112xf32, #tpu.memory_space<vmem>>, vector<1x104x112xf32>
    %177 = vector.shape_cast %176 : vector<1x104x112xf32> to vector<104x112xf32>
    %cst_158 = arith.constant dense<0.000000e+00> : vector<56x112xf32>
    %178 = tpu.matmul %175, %177, %cst_158 {dimension_numbers = #tpu.dot_dimension_numbers<[1], [0], [0], [1], [0, 0, 1, 1], [], []>} : vector<56x104xf32>, vector<104x112xf32>, vector<56x112xf32> -> vector<56x112xf32>
    %179 = arith.addf %172, %178 : vector<56x112xf32>
    %c2_159 = arith.constant 2 : index
    %c0_160 = arith.constant 0 : index
    %c0_161 = arith.constant 0 : index
    %180 = vector.load %arg19[%c2_159, %c0_160, %c0_161] : memref<4x56x26xf32, #tpu.memory_space<vmem>>, vector<1x56x26xf32>
    %181 = vector.shape_cast %180 : vector<1x56x26xf32> to vector<56x26xf32>
    %cst_162 = arith.constant dense<0.000000e+00> : vector<56x104xf32>
    %182 = tpu.matmul %181, %166, %cst_162 {dimension_numbers = #tpu.dot_dimension_numbers<[1], [0], [0], [1], [0, 0, 1, 1], [], []>} : vector<56x26xf32>, vector<26x104xf32>, vector<56x104xf32> -> vector<56x104xf32>
    %c2_163 = arith.constant 2 : index
    %c0_164 = arith.constant 0 : index
    %c0_165 = arith.constant 0 : index
    %183 = vector.load %arg20[%c2_163, %c0_164, %c0_165] : memref<4x104x112xf32, #tpu.memory_space<vmem>>, vector<1x104x112xf32>
    %184 = vector.shape_cast %183 : vector<1x104x112xf32> to vector<104x112xf32>
    %cst_166 = arith.constant dense<0.000000e+00> : vector<56x112xf32>
    %185 = tpu.matmul %182, %184, %cst_166 {dimension_numbers = #tpu.dot_dimension_numbers<[1], [0], [0], [1], [0, 0, 1, 1], [], []>} : vector<56x104xf32>, vector<104x112xf32>, vector<56x112xf32> -> vector<56x112xf32>
    %186 = arith.addf %179, %185 : vector<56x112xf32>
    %c3_167 = arith.constant 3 : index
    %c0_168 = arith.constant 0 : index
    %c0_169 = arith.constant 0 : index
    %187 = vector.load %arg19[%c3_167, %c0_168, %c0_169] : memref<4x56x26xf32, #tpu.memory_space<vmem>>, vector<1x56x26xf32>
    %188 = vector.shape_cast %187 : vector<1x56x26xf32> to vector<56x26xf32>
    %cst_170 = arith.constant dense<0.000000e+00> : vector<56x104xf32>
    %189 = tpu.matmul %188, %166, %cst_170 {dimension_numbers = #tpu.dot_dimension_numbers<[1], [0], [0], [1], [0, 0, 1, 1], [], []>} : vector<56x26xf32>, vector<26x104xf32>, vector<56x104xf32> -> vector<56x104xf32>
    %c3_171 = arith.constant 3 : index
    %c0_172 = arith.constant 0 : index
    %c0_173 = arith.constant 0 : index
    %190 = vector.load %arg20[%c3_171, %c0_172, %c0_173] : memref<4x104x112xf32, #tpu.memory_space<vmem>>, vector<1x104x112xf32>
    %191 = vector.shape_cast %190 : vector<1x104x112xf32> to vector<104x112xf32>
    %cst_174 = arith.constant dense<0.000000e+00> : vector<56x112xf32>
    %192 = tpu.matmul %189, %191, %cst_174 {dimension_numbers = #tpu.dot_dimension_numbers<[1], [0], [0], [1], [0, 0, 1, 1], [], []>} : vector<56x104xf32>, vector<104x112xf32>, vector<56x112xf32> -> vector<56x112xf32>
    %193 = arith.addf %186, %192 : vector<56x112xf32>
    %194 = arith.negf %193 : vector<56x112xf32>
    %195 = math.exp %194 : vector<56x112xf32>
    %cst_175 = arith.constant 1.000000e+00 : f32
    %196 = vector.broadcast %cst_175 : f32 to vector<56x112xf32>
    %197 = arith.addf %196, %195 : vector<56x112xf32>
    %198 = arith.divf %196, %197 : vector<56x112xf32>
    %c0_176 = arith.constant 0 : index
    %c0_177 = arith.constant 0 : index
    %199 = vector.load %arg21[%c0_176, %c0_177] : memref<56x112xf32, #tpu.memory_space<vmem>>, vector<56x112xf32>
    tpu.vector_store %arg21[%c0_176, %c0_177], %198 {strides = array<i32>} : memref<56x112xf32, #tpu.memory_space<vmem>>, vector<56x112xf32>,
    return
  }
}

</mosaic_0001>

<bundles_post_ra>
// kernel: generator_forward.1
= control target key start
LH: loop header
LB: loop body
LE: loop exit
PB: predicated region body
PF: predicated region fallthrough
CT: control target
= control target key end

     0   :  { %vm74_vm0 = vcmask 1041408   ;;  %vm70_vm1 = vcmask 15360   ;;  %vm128_vm2 = vcmask 130048   ;;  %vm372_vm6 = vcmask 261120   ;;  %s3386_s0 = inlined_call_operand.vmem [shape: f32[2,16], index: 0, kind: input, shape index: {}]   ;;  %s3387_s1 = inlined_call_operand.vmem [shape: f32[4,8,2], index: 1, kind: input, shape index: {}]   ;;  %s3388_s2 = inlined_call_operand.vmem [shape: f32[4,16,128], index: 2, kind: input, shape index: {}]   ;;  %s3389_s3 = inlined_call_operand.vmem [shape: f32[128,32], index: 3, kind: input, shape index: {}]   ;;  %s3390_s4 = inlined_call_operand.vmem [shape: f32[32,128], index: 4, kind: input, shape index: {}]   ;;  %s3391_s5 = inlined_call_operand.vmem [shape: f32[1,32], index: 5, kind: input, shape index: {}]   ;;  %s3392_s6 = inlined_call_operand.vmem [shape: f32[1,32], index: 6, kind: input, shape index: {}]   ;;  %s3393_s8 = inlined_call_operand.vmem [shape: f32[3,128,112], index: 8, kind: input, shape index: {}]   ;;  %s3394_s7 = inlined_call_operand.vmem [shape: f32[3,14,8], index: 7, kind: input, shape index: {}]   ;;  %s3395_s9 = inlined_call_operand.vmem [shape: f32[112,16], index: 9, kind: input, shape index: {}]   ;;  %s3396_s10 = inlined_call_operand.vmem [shape: f32[16,112], index: 10, kind: input, shape index: {}]   ;;  %s3397_s11 = inlined_call_operand.vmem [shape: f32[1,16], index: 11, kind: input, shape index: {}]   ;;  %s3398_s12 = inlined_call_operand.vmem [shape: f32[1,16], index: 12, kind: input, shape index: {}]   ;;  %s3399_s13 = inlined_call_operand.vmem [shape: f32[3,26,14], index: 13, kind: input, shape index: {}]   ;;  %s3400_s14 = inlined_call_operand.vmem [shape: f32[3,112,104], index: 14, kind: input, shape index: {}]   ;;  %s3401_s15 = inlined_call_operand.vmem [shape: f32[104,8], index: 15, kind: input, shape index: {}]   ;;  %s3402_s16 = inlined_call_operand.vmem [shape: f32[8,104], index: 16, kind: input, shape index: {}]   ;;  %s3403_s20 = inlined_call_operand.vmem [shape: f32[4,104,112], index: 20, kind: input, shape index: {}]   ;;  %s3404_s17 = inlined_call_operand.vmem [shape: f32[1,8], index: 17, kind: input, shape index: {}]   ;;  %s3405_s18 = inlined_call_operand.vmem [shape: f32[1,8], index: 18, kind: input, shape index: {}]   ;;  %s3406_s19 = inlined_call_operand.vmem [shape: f32[4,56,26], index: 19, kind: input, shape index: {}]   ;;  %s3407_s21 = inlined_call_operand.vmem [shape: f32[56,112], index: 21, kind: output, shape index: {}]  }
   0x1   :  { %3412 = sst [smem:[#allocation2_spill]] %s3386_s0  ;;  %vm426_vm7 = vcmask 64512   ;;  %vm641_vm8 = vcmask 916480   ;;  %vm643_vm9 = vcmask 914432   ;;  %vm816_vm13 = vcmask 1045504  }
   0x2   :  { %3413 = sst [smem:[#allocation3_spill]] %s3387_s1  ;;  %vm803_vm14 = vcmask 113664   ;;  %vm1112_vm15 = vcmask 850944  }
   0x3   :  { %3414 = sst [smem:[#allocation4_spill]] %s3388_s2 }
   0x4   :  { %3415 = sst [smem:[#allocation5_spill]] %s3389_s3 }
   0x5   :  { %3416 = sst [smem:[#allocation6_spill]] %s3390_s4 }
   0x6   :  { %3417 = sst [smem:[#allocation7_spill]] %s3391_s5 }
   0x7   :  { %s3418_s26 = sld [smem:[#allocation2_spill]] }
   0x8   :  { %s3419_s28 = sld [smem:[#allocation3_spill]] }
   0x9   :  { %s3420_s5 = sld [smem:[#allocation4_spill]] }
   0xa   :  { %s3421_s27 = sld [smem:[#allocation5_spill]] }
   0xb   :  { %s3422_s0 = sld [smem:[#allocation6_spill]] }
   0xc   :  { %s3423_s25 = sld [smem:[#allocation7_spill]] }
   0xd   :  { %v68_v0 = vld [vmem:[%s3418_s26] sm:$0x3] }
   0xe   :  { %v69_v1 = vld [vmem:[%s3419_s28] sm:$0xff]  ;;  %v2006_v2 = vld [vmem:[%s3419_s28 + $0x8] sm:$0xff]  ;;  %2004 = vmatpush.msk.msra.mxu0 %vm74_vm0, %v68_v0  ;;  %2007 = vmatpush.msk.msra.mxu1 %vm74_vm0, %v68_v0  ;;  %v2013_v5 = vld [vmem:[%s3419_s28 + $0x10] sm:$0xff] }
   0xf   :  { %v2010_v3 = vld [vmem:[%s3420_s5 + $0x18] sm:$0xff]  ;;  %v99_v4 = vld [vmem:[%s3420_s5 + $0x8] sm:$0xff]  ;;  %2005 = vmatmul.msk.f32.vlgmr.msra.gmra.mxu0 %vm70_vm1, %v69_v1  ;;  %2008 = vmatmul.msk.f32.vlgmr.msra.gmra.mxu1 %vm70_vm1, %v2006_v2  ;;  %v2009_v6 = vld [vmem:[%s3420_s5 + $0x10] sm:$0xff] }
  0x10   :  { %2014 = vmatpush.msk.msrb.mxu0 %vm74_vm0, %v68_v0  ;;  %146 = vmatpush.msra.mxu2 %v2010_v3  ;;  %v98_v7 = vld [vmem:[%s3420_s5] sm:$0xff]  ;;  %v2017_v8 = vld [vmem:[%s3420_s5 + $0x28] sm:$0xff]  ;;  %v2019_v12 = vld [vmem:[%s3419_s28 + $0x18] sm:$0xff] }
  0x11   :  { %169 = vmatpush.msrb.mxu1 %v99_v4  ;;  %v2016_v9 = vld [vmem:[%s3420_s5 + $0x20] sm:$0xff]  ;;  %v2023_v14 = vld [vmem:[%s3420_s5 + $0x38] sm:$0xff]  ;;  %v2022_v15 = vld [vmem:[%s3420_s5 + $0x30] sm:$0xff] }
  0x12   :  { %147 = vmatpush.msra.mxu2 %v2009_v6  ;;  %272 = vmatpush.msra.mxu3 %v2023_v14  ;;  %v307_v16 = vld [vmem:[%s3421_s27 + $0x78] sm:$0xff]  ;;  %v306_v17 = vld [vmem:[%s3421_s27 + $0x70] sm:$0xff]  ;;  %v305_v18 = vld [vmem:[%s3421_s27 + $0x68] sm:$0xff] }
  0x13   :  { %170 = vmatpush.msrb.mxu1 %v98_v7  ;;  %308 = vmatpush.msra.mxu0 %v307_v16  ;;  %v304_v19 = vld [vmem:[%s3421_s27 + $0x60] sm:$0xff]  ;;  %v303_v20 = vld [vmem:[%s3421_s27 + $0x58] sm:$0xff]  ;;  %v302_v21 = vld [vmem:[%s3421_s27 + $0x50] sm:$0xff] }
  0x14   :  { %2020 = vmatpush.msk.msrb.mxu2 %vm74_vm0, %v68_v0  ;;  %273 = vmatpush.msra.mxu3 %v2022_v15  ;;  %v301_v22 = vld [vmem:[%s3421_s27 + $0x48] sm:$0xff]  ;;  %v300_v23 = vld [vmem:[%s3421_s27 + $0x40] sm:$0xff]  ;;  %v299_v26 = vld [vmem:[%s3421_s27 + $0x38] sm:$0xff] }
  0x15   :  { %220 = vmatpush.msra.mxu1 %v2017_v8  ;;  %309 = vmatpush.msra.mxu0 %v306_v17  ;;  %v298_v27 = vld [vmem:[%s3421_s27 + $0x30] sm:$0xff]  ;;  %v297_v28 = vld [vmem:[%s3421_s27 + $0x28] sm:$0xff]  ;;  %v296_v29 = vld [vmem:[%s3421_s27 + $0x20] sm:$0xff] }
  0x16   :  { %v295_v30 = vld [vmem:[%s3421_s27 + $0x18] sm:$0xff]  ;;  %v294_v31 = vld [vmem:[%s3421_s27 + $0x10] sm:$0xff]  ;;  %v293_v32 = vld [vmem:[%s3421_s27 + $0x8] sm:$0xff] }
  0x17   :  { %2015 = vmatmul.msk.f32.vlgmr.msrb.gmra.mxu0 %vm70_vm1, %v2013_v5  ;;  %221 = vmatpush.msra.mxu1 %v2016_v9  ;;  %v292_v33 = vld [vmem:[%s3421_s27] sm:$0xff]  ;;  %v371_v53 = vld [vmem:[%s3422_s0 + $0x18] sm:$0xff]  ;;  %v370_v54 = vld [vmem:[%s3422_s0 + $0x10] sm:$0xff] }
  0x18   :  { %310 = vmatpush.msra.mxu0 %v305_v18  ;;  %v369_v55 = vld [vmem:[%s3422_s0 + $0x8] sm:$0xff]  ;;  %v368_v56 = vld [vmem:[%s3422_s0] sm:$0xff] }
  0x19   :  { %v352_v6 = vld [vmem:[%s3423_s25] sm:$0x1]  ;;  %v2066_v14 = vld [vmem:[%s3393_s8 + $0x168] sm:$0xff] }
  0x1a   :  { %311 = vmatpush.msra.mxu0 %v304_v19  ;;  %v365_v9 = vld [vmem:[%s3392_s6] sm:$0x1] }
  0x1b   :  { %v2065_v15 = vld [vmem:[%s3393_s8 + $0x160] sm:$0xff] }
  0x1c   :  { %312 = vmatpush.msra.mxu0 %v303_v20 }
  0x1e   :  { %313 = vmatpush.msra.mxu0 %v302_v21 }
  0x20   :  { %314 = vmatpush.msra.mxu0 %v301_v22 }
  0x22   :  { %315 = vmatpush.msra.mxu0 %v300_v23 }
  0x24   :  { %316 = vmatpush.msra.mxu0 %v299_v26 }
  0x26   :  { %317 = vmatpush.msra.mxu0 %v298_v27 }
  0x28   :  { %318 = vmatpush.msra.mxu0 %v297_v28 }
  0x2a   :  { %319 = vmatpush.msra.mxu0 %v296_v29 }
  0x2c   :  { %320 = vmatpush.msra.mxu0 %v295_v30 }
  0x2e   :  { %321 = vmatpush.msra.mxu0 %v294_v31 }
  0x30   :  { %322 = vmatpush.msra.mxu0 %v293_v32 }
  0x32   :  { %323 = vmatpush.msra.mxu0 %v292_v33 }
  0x34   :  { %411 = vmatpush.msrb.mxu0 %v371_v53 }
  0x36   :  { %412 = vmatpush.msrb.mxu0 %v370_v54 }
  0x38   :  { %413 = vmatpush.msrb.mxu0 %v369_v55 }
  0x3a   :  { %414 = vmatpush.msrb.mxu0 %v368_v56 }
  0x8c   :  { %v95_v10 = vpop.f32.mrf.mxu0  ;;  %v122_v11 = vpop.f32.mrf.mxu1 }
  0x8d   :  { %2011 = vmatmul.msk.f32.vlgmr.msra.gmra.mxu2 %vm128_vm2, %v122_v11  ;;  %2012 = vmatmul.msk.f32.vlgmr.msrb.gmra.mxu1 %vm128_vm2, %v95_v10 }
  0x8e   :  { %329 = vmatpush.msrb.mxu1 %v307_v16  ;;  %388 = vmatpush.msra.mxu2 %v371_v53  ;;  %v2064_v16 = vld [vmem:[%s3393_s8 + $0x158] sm:$0xff] }
  0x8f   :  { %v2040_v53 = vld [vmem:[%s3393_s8 + $0xb8] sm:$0xff] }
  0x90   :  { %330 = vmatpush.msrb.mxu1 %v306_v17  ;;  %389 = vmatpush.msra.mxu2 %v370_v54  ;;  %v462_v54 = vld [vmem:[%s3393_s8 + $0x30] sm:$0xff] }
  0x92   :  { %331 = vmatpush.msrb.mxu1 %v305_v18  ;;  %390 = vmatpush.msra.mxu2 %v369_v55  ;;  %v2039_v55 = vld [vmem:[%s3393_s8 + $0xb0] sm:$0xff] }
  0x94   :  { %v197_v13 = vpop.f32.mrf.mxu0  ;;  %332 = vmatpush.msrb.mxu1 %v304_v19  ;;  %391 = vmatpush.msra.mxu2 %v368_v56  ;;  %v2063_v19 = vld [vmem:[%s3393_s8 + $0x150] sm:$0xff]  ;;  %v461_v56 = vld [vmem:[%s3393_s8 + $0x28] sm:$0xff] }
  0x95   :  { %2018 = vmatmul.msk.f32.vlgmr.msra.gmra.mxu1 %vm128_vm2, %v197_v13  ;;  %2021 = vmatmul.msk.f32.vlgmr.msrb.gmra.mxu2 %vm70_vm1, %v2019_v12  ;;  %v2068_v12 = vld [vmem:[%s3393_s8 + $0x178] sm:$0xff]  ;;  %v2067_v13 = vld [vmem:[%s3393_s8 + $0x170] sm:$0xff]  ;;  %vm1118_vm1 = vcmask 844800  }
  0x96   :  { %333 = vmatpush.msrb.mxu1 %v303_v20 }
  0x98   :  { %334 = vmatpush.msrb.mxu1 %v302_v21  ;;  %v2062_v21 = vld [vmem:[%s3393_s8 + $0x148] sm:$0xff] }
  0x9a   :  { %335 = vmatpush.msrb.mxu1 %v301_v22 }
  0x9c   :  { %336 = vmatpush.msrb.mxu1 %v300_v23 }
  0x9e   :  { %337 = vmatpush.msrb.mxu1 %v299_v26  ;;  %v2060_v26 = vld [vmem:[%s3393_s8 + $0x138] sm:$0xff] }
  0xa0   :  { %338 = vmatpush.msrb.mxu1 %v298_v27 }
  0xa2   :  { %339 = vmatpush.msrb.mxu1 %v297_v28  ;;  %v424_v28 = vld [vmem:[%s3394_s7] sm:$0xff] }
  0xa4   :  { %340 = vmatpush.msrb.mxu1 %v296_v29  ;;  %v2029_v29 = vld [vmem:[%s3394_s7 + $0x10] sm:$0xff] }
  0xa6   :  { %341 = vmatpush.msrb.mxu1 %v295_v30  ;;  %v2049_v30 = vld [vmem:[%s3394_s7 + $0x20] sm:$0xff] }
  0xa8   :  { %342 = vmatpush.msrb.mxu1 %v294_v31  ;;  %v2048_v31 = vld [vmem:[%s3393_s8 + $0xf8] sm:$0xff] }
  0xaa   :  { %343 = vmatpush.msrb.mxu1 %v293_v32  ;;  %v471_v32 = vld [vmem:[%s3393_s8 + $0x78] sm:$0xff] }
  0xac   :  { %344 = vmatpush.msrb.mxu1 %v292_v33  ;;  %v2059_v33 = vld [vmem:[%s3393_s8 + $0x130] sm:$0xff] }
  0xae   :  { %616 = vmatpush.msra.mxu1 %v2068_v12 }
  0xb0   :  { %617 = vmatpush.msra.mxu1 %v2067_v13 }
  0xb2   :  { %618 = vmatpush.msra.mxu1 %v2066_v14 }
  0xb4   :  { %619 = vmatpush.msra.mxu1 %v2065_v15  ;;  %v676_v15 = vld [vmem:[%s3395_s9 + $0x68] sm:$0xff] }
  0xb6   :  { %620 = vmatpush.msra.mxu1 %v2064_v16  ;;  %v675_v16 = vld [vmem:[%s3395_s9 + $0x60] sm:$0xff] }
  0xb8   :  { %621 = vmatpush.msra.mxu1 %v2063_v19  ;;  %v672_v19 = vld [vmem:[%s3395_s9 + $0x48] sm:$0xff] }
  0xba   :  { %622 = vmatpush.msra.mxu1 %v2062_v21  ;;  %v670_v21 = vld [vmem:[%s3395_s9 + $0x38] sm:$0xff] }
 0x10a   :  { %v172_v34 = vpop.f32.mrf.mxu1 }
 0x110   :  { %v149_v24 = vpop.f32.mrf.mxu2 }
 0x111   :  { %v173_v35 = vadd.f32 %v172_v34, %v149_v24  ;;  %v2061_v24 = vld [vmem:[%s3393_s8 + $0x140] sm:$0xff]  ;;  %v2047_v34 = vld [vmem:[%s3393_s8 + $0xf0] sm:$0xff] }
 0x112   :  { %v223_v36 = vpop.f32.mrf.mxu1  ;;  %623 = vmatpush.msra.mxu1 %v2061_v24  ;;  %v667_v24 = vld [vmem:[%s3395_s9 + $0x20] sm:$0xff] }
 0x113   :  { %v226_v37 = vadd.f32 %v223_v36, %v173_v35  ;;  %v470_v35 = vld [vmem:[%s3393_s8 + $0x70] sm:$0xff]  ;;  %v2058_v36 = vld [vmem:[%s3393_s8 + $0x128] sm:$0xff] }
 0x114   :  { %624 = vmatpush.msra.mxu1 %v2060_v26  ;;  %v665_v26 = vld [vmem:[%s3395_s9 + $0x10] sm:$0xff] }
 0x116   :  { %625 = vmatpush.msra.mxu1 %v2059_v33 }
 0x118   :  { %v249_v25 = vpop.f32.mrf.mxu2  ;;  %626 = vmatpush.msra.mxu1 %v2058_v36 }
 0x119   :  { %2024 = vmatmul.msk.f32.vlgmr.msra.gmra.mxu3 %vm128_vm2, %v249_v25 }
 0x19c   :  { %v275_v38 = vpop.f32.mrf.mxu3 }
 0x19d   :  { %v2512_v39 = vadd.f32 %v275_v38, %v226_v37  ;;  %v2046_v37 = vld [vmem:[%s3393_s8 + $0xe8] sm:$0xff] }
 0x19e   :  { %v469_v38 = vld [vmem:[%s3393_s8 + $0x68] sm:$0xff] }
 0x19f   :  { %v279_v40 = vrot.slane %v2512_v39, 4  ;;  %v285_v41 = vmul.f32 %v2512_v39, %v2512_v39 }
 0x1a1   :  { %v280_v42 = vadd.f32 %v279_v40, %v2512_v39  ;;  %v286_v43 = vrot.slane %v285_v41, 4  ;;  %v468_v40 = vld [vmem:[%s3393_s8 + $0x60] sm:$0xff] }
 0x1a3   :  { %v281_v44 = vrot.slane %v280_v42, 2  ;;  %v287_v45 = vadd.f32 %v286_v43, %v285_v41  ;;  %v2030_v41 = vld [vmem:[%s3394_s7 + $0x18] sm:$0x3f]  ;;  %v2045_v43 = vld [vmem:[%s3393_s8 + $0xe0] sm:$0xff] }
 0x1a5   :  { %v282_v46 = vadd.f32 %v281_v44, %v280_v42  ;;  %v288_v47 = vrot.slane %v287_v45, 2  ;;  %v2050_v42 = vld [vmem:[%s3394_s7 + $0x28] sm:$0x3f]  ;;  %v467_v44 = vld [vmem:[%s3393_s8 + $0x58] sm:$0xff] }
 0x1a7   :  { %v283_v48 = vrot.slane %v282_v46, 1  ;;  %v289_v49 = vadd.f32 %v288_v47, %v287_v45  ;;  %v2044_v45 = vld [vmem:[%s3393_s8 + $0xd8] sm:$0xff]  ;;  %v2043_v47 = vld [vmem:[%s3393_s8 + $0xd0] sm:$0xff] }
 0x1a9   :  { %v284_v50 = vadd.f32 %v283_v48, %v282_v46  ;;  %v290_v51 = vrot.slane %v289_v49, 1  ;;  %v466_v46 = vld [vmem:[%s3393_s8 + $0x50] sm:$0xff]  ;;  %v465_v48 = vld [vmem:[%s3393_s8 + $0x48] sm:$0xff] }
 0x1ab   :  { %324 = vmatmul.f32.vlgmr.msra.gmra.mxu0 %v284_v50  ;;  %v291_v52 = vadd.f32 %v290_v51, %v289_v49  ;;  %v2042_v49 = vld [vmem:[%s3393_s8 + $0xc8] sm:$0xff]  ;;  %v464_v50 = vld [vmem:[%s3393_s8 + $0x40] sm:$0xff] }
 0x1ac   :  { %v2041_v51 = vld [vmem:[%s3393_s8 + $0xc0] sm:$0xff] }
 0x1ad   :  { %345 = vmatmul.f32.vlgmr.msrb.gmra.mxu1 %v291_v52  ;;  %v463_v52 = vld [vmem:[%s3393_s8 + $0x38] sm:$0xff] }
 0x228   :  { %v325_v57 = vpop.f32.mrf.mxu0 }
 0x229   :  { %v328_v58 = vmul.f32 0.03125, %v325_v57  ;;  %v2038_v57 = vld [vmem:[%s3393_s8 + $0xa8] sm:$0xff] }
 0x22a   :  { %v346_v59 = vpop.f32.mrf.mxu1 }
 0x22b   :  { %v350_v60 = vmul.f32 %v328_v58, %v328_v58  ;;  %v349_v61 = vmul.f32 0.03125, %v346_v59  ;;  %v2037_v59 = vld [vmem:[%s3393_s8 + $0xa0] sm:$0xff] }
 0x22d   :  { %v351_v62 = vsub.f32 %v349_v61, %v350_v60  ;;  %v459_v60 = vld [vmem:[%s3393_s8 + $0x18] sm:$0xff] }
 0x22e   :  { %v2036_v61 = vld [vmem:[%s3393_s8 + $0x98] sm:$0xff] }
 0x22f   :  { %v353_v63 = vadd.f32 1e-05, %v351_v62  ;;  %v458_v62 = vld [vmem:[%s3393_s8 + $0x10] sm:$0xff] }
 0x231   :  { %2269 = vrsqrt.f32 %v353_v63  ;;  %vm360_vm4 = vweird.f32 %v353_v63 }
 0x237   :  { %v2270_v0 = vpop.eup %2269 }
 0x238   :  { %v355_v1 = vmul.f32 %v2270_v0, %v353_v63  ;;  %vm361_vm3 = vweird.f32 %v2270_v0  ;;  %v2035_v63 = vld [vmem:[%s3393_s8 + $0x90] sm:$0xff] }
 0x239   :  { %vm362_vm5 = vmor %vm360_vm4, %vm361_vm3 }
 0x23a   :  { %v356_v2 = vmul.f32 %v2270_v0, %v355_v1  ;;  %v2034_v1 = vld [vmem:[%s3393_s8 + $0x88] sm:$0xff] }
 0x23c   :  { %v357_v3 = vmul.f32 0.5, %v356_v2  ;;  %v2033_v2 = vld [vmem:[%s3393_s8 + $0x80] sm:$0xff] }
 0x23e   :  { %v358_v4 = vsub.f32 1.5, %v357_v3  ;;  %v456_v3 = vld [vmem:[%s3393_s8] sm:$0xff] }
 0x240   :  { %v359_v5 = vmul.f32 %v2270_v0, %v358_v4  ;;  %v2057_v4 = vld [vmem:[%s3393_s8 + $0x120] sm:$0xff] }
 0x241   :  { %627 = vmatpush.msra.mxu1 %v2057_v4 }
 0x242   :  { %v363_v7 = vsel %vm362_vm5, %v2270_v0, %v359_v5  ;;  %v457_v0 = vld [vmem:[%s3393_s8 + $0x8] sm:$0xff]  ;;  %v2056_v5 = vld [vmem:[%s3393_s8 + $0x118] sm:$0xff]  ;;  %vm1291_vm5 = vcmask 211968  }
 0x243   :  { %v364_v8 = vmul.f32 %v363_v7, %v352_v6  ;;  %v2055_v6 = vld [vmem:[%s3393_s8 + $0x110] sm:$0xff]  ;;  %628 = vmatpush.msra.mxu1 %v2056_v5  ;;  %v2054_v7 = vld [vmem:[%s3393_s8 + $0x108] sm:$0xff] }
 0x245   :  { %2025 = vmatmul.msk.f32.vlgmr.msra.gmra.mxu2 %vm372_vm6, %v364_v8  ;;  %v366_v10 = vmul.f32 %v364_v8, %v328_v58  ;;  %v460_v58 = vld [vmem:[%s3393_s8 + $0x20] sm:$0xff]  ;;  %629 = vmatpush.msra.mxu1 %v2055_v6 }
 0x246   :  { %v2053_v8 = vld [vmem:[%s3393_s8 + $0x100] sm:$0xff] }
 0x247   :  { %v367_v11 = vsub.f32 %v365_v9, %v366_v10  ;;  %630 = vmatpush.msra.mxu1 %v2054_v7 }
 0x249   :  { %2026 = vmatmul.msk.f32.vlgmr.msrb.gmra.mxu0 %vm372_vm6, %v367_v11  ;;  %631 = vmatpush.msra.mxu1 %v2053_v8 }
 0x2c6   :  { %v416_v17 = vpop.f32.mrf.mxu0 }
 0x2c7   :  { %v421_v22 = vperm.slane %v416_v17, 0  ;;  %v674_v17 = vld [vmem:[%s3395_s9 + $0x58] sm:$0xff] }
 0x2c8   :  { %v393_v18 = vpop.f32.mrf.mxu2 }
 0x2c9   :  { %v419_v20 = vperm.slane %v393_v18, 0  ;;  %v673_v18 = vld [vmem:[%s3395_s9 + $0x50] sm:$0xff] }
 0x2cb   :  { %v420_v23 = vmul.f32 %v419_v20, %v2512_v39  ;;  %v425_v39 = vld [vmem:[%s3394_s7 + $0x8] sm:$0x3f]  ;;  %v671_v20 = vld [vmem:[%s3395_s9 + $0x40] sm:$0xff] }
 0x2cd   :  { %v422_v25 = vadd.f32 %v421_v22, %v420_v23  ;;  %v669_v22 = vld [vmem:[%s3395_s9 + $0x30] sm:$0xff]  ;;  %v668_v23 = vld [vmem:[%s3395_s9 + $0x28] sm:$0xff] }
 0x2cf   :  { %v423_v27 = vmax.f32 %v422_v25, 0.0  ;;  %v666_v25 = vld [vmem:[%s3395_s9 + $0x18] sm:$0xff] }
 0x2d1   :  { %448 = vmatpush.msrb.mxu2 %v423_v27  ;;  %496 = vmatpush.msrb.mxu3 %v423_v27 }
 0x2d2   :  { %591 = vmatpush.msra.mxu0 %v423_v27  ;;  %2027 = vmatmul.msk.f32.vlgmr.msrb.gmra.mxu2 %vm426_vm7, %v424_v28  ;;  %v664_v27 = vld [vmem:[%s3395_s9 + $0x8] sm:$0xff]  ;;  %v663_v28 = vld [vmem:[%s3395_s9] sm:$0xff] }
 0x2d3   :  { %2031 = vmatmul.msk.f32.vlgmr.msrb.gmra.mxu3 %vm426_vm7, %v2029_v29  ;;  %2051 = vmatmul.msk.f32.vlgmr.msra.gmra.mxu0 %vm426_vm7, %v2049_v30 }
 0x2d4   :  { %521 = vmatpush.msra.mxu2 %v2048_v31  ;;  %544 = vmatpush.msra.mxu3 %v471_v32 }
 0x2d5   :  { %682 = vmatpush.msrb.mxu0 %v676_v15 }
 0x2d6   :  { %522 = vmatpush.msra.mxu2 %v2047_v34  ;;  %545 = vmatpush.msra.mxu3 %v470_v35 }
 0x2d7   :  { %683 = vmatpush.msrb.mxu0 %v675_v16 }
 0x2d8   :  { %523 = vmatpush.msra.mxu2 %v2046_v37  ;;  %546 = vmatpush.msra.mxu3 %v469_v38 }
 0x2d9   :  { %684 = vmatpush.msrb.mxu0 %v674_v17 }
 0x2da   :  { %2028 = vmatmul.msk.f32.gmra.mxu2 %vm426_vm7, %v425_v39  ;;  %547 = vmatpush.msra.mxu3 %v468_v40 }
 0x2db   :  { %2032 = vmatmul.msk.f32.gmra.mxu3 %vm426_vm7, %v2030_v41  ;;  %2052 = vmatmul.msk.f32.gmra.mxu0 %vm426_vm7, %v2050_v42 }
 0x2dc   :  { %524 = vmatpush.msra.mxu2 %v2045_v43  ;;  %548 = vmatpush.msra.mxu3 %v467_v44 }
 0x2dd   :  { %685 = vmatpush.msrb.mxu0 %v673_v18 }
 0x2de   :  { %525 = vmatpush.msra.mxu2 %v2044_v45  ;;  %549 = vmatpush.msra.mxu3 %v466_v46 }
 0x2df   :  { %686 = vmatpush.msrb.mxu0 %v672_v19 }
 0x2e0   :  { %526 = vmatpush.msra.mxu2 %v2043_v47  ;;  %550 = vmatpush.msra.mxu3 %v465_v48 }
 0x2e1   :  { %687 = vmatpush.msrb.mxu0 %v671_v20 }
 0x2e2   :  { %527 = vmatpush.msra.mxu2 %v2042_v49  ;;  %551 = vmatpush.msra.mxu3 %v464_v50 }
 0x2e3   :  { %688 = vmatpush.msrb.mxu0 %v670_v21 }
 0x2e4   :  { %528 = vmatpush.msra.mxu2 %v2041_v51  ;;  %552 = vmatpush.msra.mxu3 %v463_v52 }
 0x2e5   :  { %689 = vmatpush.msrb.mxu0 %v669_v22 }
 0x2e6   :  { %529 = vmatpush.msra.mxu2 %v2040_v53  ;;  %553 = vmatpush.msra.mxu3 %v462_v54 }
 0x2e7   :  { %690 = vmatpush.msrb.mxu0 %v668_v23 }
 0x2e8   :  { %530 = vmatpush.msra.mxu2 %v2039_v55  ;;  %554 = vmatpush.msra.mxu3 %v461_v56 }
 0x2e9   :  { %691 = vmatpush.msrb.mxu0 %v667_v24 }
 0x2ea   :  { %531 = vmatpush.msra.mxu2 %v2038_v57  ;;  %555 = vmatpush.msra.mxu3 %v460_v58 }
 0x2eb   :  { %692 = vmatpush.msrb.mxu0 %v666_v25 }
 0x2ec   :  { %532 = vmatpush.msra.mxu2 %v2037_v59  ;;  %556 = vmatpush.msra.mxu3 %v459_v60  ;;  %v744_v59 = vld [vmem:[%s3396_s10 + $0x8] sm:$0xff]  ;;  %v743_v60 = vld [vmem:[%s3396_s10] sm:$0xff] }
 0x2ed   :  { %693 = vmatpush.msrb.mxu0 %v665_v26 }
 0x2ee   :  { %533 = vmatpush.msra.mxu2 %v2036_v61  ;;  %557 = vmatpush.msra.mxu3 %v458_v62 }
 0x2ef   :  { %694 = vmatpush.msrb.mxu0 %v664_v27 }
 0x2f0   :  { %534 = vmatpush.msra.mxu2 %v2035_v63  ;;  %558 = vmatpush.msra.mxu3 %v457_v0 }
 0x2f1   :  { %695 = vmatpush.msrb.mxu0 %v663_v28 }
 0x2f2   :  { %535 = vmatpush.msra.mxu2 %v2034_v1  ;;  %559 = vmatpush.msra.mxu3 %v456_v3 }
 0x2f4   :  { %536 = vmatpush.msra.mxu2 %v2033_v2  ;;  %762 = vmatpush.msrb.mxu3 %v744_v59 }
 0x2f6   :  { %706 = vmatpush.msrb.mxu2 %v676_v15  ;;  %763 = vmatpush.msrb.mxu3 %v743_v60 }
 0x2f8   :  { %707 = vmatpush.msrb.mxu2 %v675_v16 }
 0x2fa   :  { %708 = vmatpush.msrb.mxu2 %v674_v17 }
 0x2fc   :  { %709 = vmatpush.msrb.mxu2 %v673_v18 }
 0x2fe   :  { %710 = vmatpush.msrb.mxu2 %v672_v19 }
 0x300   :  { %711 = vmatpush.msrb.mxu2 %v671_v20 }
 0x302   :  { %712 = vmatpush.msrb.mxu2 %v670_v21 }
 0x304   :  { %713 = vmatpush.msrb.mxu2 %v669_v22 }
 0x306   :  { %714 = vmatpush.msrb.mxu2 %v668_v23 }
 0x308   :  { %715 = vmatpush.msrb.mxu2 %v667_v24 }
 0x30a   :  { %716 = vmatpush.msrb.mxu2 %v666_v25 }
 0x30c   :  { %717 = vmatpush.msrb.mxu2 %v665_v26  ;;  %v799_v26 = vld [vmem:[%s3399_s13] sm:$0xff] }
 0x30e   :  { %718 = vmatpush.msrb.mxu2 %v664_v27  ;;  %v2078_v27 = vld [vmem:[%s3399_s13 + $0x20] sm:$0xff] }
 0x310   :  { %719 = vmatpush.msrb.mxu2 %v663_v28  ;;  %v800_v28 = vld [vmem:[%s3399_s13 + $0x8] sm:$0xff] }
 0x350   :  { %v593_v9 = vpop.f32.mrf.mxu0 }
 0x351   :  { %632 = vmatmul.f32.vlgmr.msra.gmra.mxu1 %v593_v9  ;;  %v727_v9 = vld [vmem:[%s3397_s11] sm:$0x1] }
 0x355   :  { %v450_v10 = vpop.f32.mrf.mxu2 }
 0x356   :  { %v498_v11 = vpop.f32.mrf.mxu3  ;;  %560 = vmatmul.f32.vlgmr.msra.gmra.mxu3 %v450_v10 }
 0x357   :  { %537 = vmatmul.f32.vlgmr.msra.gmra.mxu2 %v498_v11  ;;  %785 = vmatpush.msra.mxu3 %v744_v59  ;;  %v2091_v59 = vld [vmem:[%s3400_s14 + $0x90] sm:$0xff] }
 0x358   :  { %v596_v12 = vpop.f32.mrf.mxu0 }
 0x359   :  { %635 = vmatmul.f32.gmra.mxu1 %v596_v12  ;;  %786 = vmatpush.msra.mxu3 %v743_v60  ;;  %v853_v60 = vld [vmem:[%s3400_s14 + $0x20] sm:$0xff] }
 0x35d   :  { %v453_v13 = vpop.f32.mrf.mxu2 }
 0x35e   :  { %v501_v14 = vpop.f32.mrf.mxu3  ;;  %563 = vmatmul.f32.gmra.mxu3 %v453_v13 }
 0x35f   :  { %540 = vmatmul.f32.gmra.mxu2 %v501_v14  ;;  %v740_v14 = vld [vmem:[%s3398_s12] sm:$0x1] }
 0x3ce   :  { %v633_v29 = vpop.f32.mrf.mxu1 }
 0x3d6   :  { %v636_v36 = vpop.f32.mrf.mxu1 }
 0x3d9   :  { %v561_v30 = vpop.f32.mrf.mxu3 }
 0x3da   :  { %v538_v31 = vpop.f32.mrf.mxu2 }
 0x3db   :  { %v562_v32 = vadd.f32 %v561_v30, %v538_v31  ;;  %v862_v30 = vld [vmem:[%s3400_s14 + $0x68] sm:$0xff]  ;;  %v2099_v31 = vld [vmem:[%s3400_s14 + $0xd0] sm:$0xff] }
 0x3dd   :  { %v2747_v33 = vadd.f32 %v633_v29, %v562_v32  ;;  %v2100_v29 = vld [vmem:[%s3400_s14 + $0xd8] sm:$0xff]  ;;  %v861_v32 = vld [vmem:[%s3400_s14 + $0x60] sm:$0xff] }
 0x3df   :  { %v652_v38 = vmul.f32 %v2747_v33, %v2747_v33  ;;  %v642_v40 = vsel %vm641_vm8, %v2747_v33, 0.0 }
 0x3e1   :  { %v564_v34 = vpop.f32.mrf.mxu3  ;;  %v654_v44 = vsel %vm641_vm8, %v652_v38, 0.0  ;;  %v2097_v38 = vld [vmem:[%s3400_s14 + $0xc0] sm:$0xff] }
 0x3e2   :  { %v541_v35 = vpop.f32.mrf.mxu2 }
 0x3e3   :  { %v565_v37 = vadd.f32 %v564_v34, %v541_v35  ;;  %v2131_v34 = vld [vmem:[%s3400_s14 + $0x148] sm:$0xff]  ;;  %v860_v35 = vld [vmem:[%s3400_s14 + $0x58] sm:$0xff] }
 0x3e5   :  { %v640_v39 = vadd.f32 %v636_v36, %v565_v37  ;;  %v2130_v36 = vld [vmem:[%s3400_s14 + $0x140] sm:$0xff] }
 0x3e6   :  { %v2109_v37 = vld [vmem:[%s3399_s13 + $0x40] sm:$0xff] }
 0x3e7   :  { %v644_v41 = vsel %vm643_vm9, %v640_v39, 0.0  ;;  %v653_v42 = vmul.f32 %v640_v39, %v640_v39 }
 0x3e8   :  { %v645_v43 = vadd.f32 %v644_v41, %v642_v40  ;;  %v859_v40 = vld [vmem:[%s3400_s14 + $0x50] sm:$0xff] }
 0x3e9   :  { %v655_v45 = vsel %vm643_vm9, %v653_v42, 0.0  ;;  %v801_v41 = vld [vmem:[%s3399_s13 + $0x10] sm:$0xff]  ;;  %v2096_v42 = vld [vmem:[%s3400_s14 + $0xb8] sm:$0xff] }
 0x3ea   :  { %v646_v46 = vrot.slane %v645_v43, 4  ;;  %v656_v47 = vadd.f32 %v655_v45, %v654_v44  ;;  %v2129_v44 = vld [vmem:[%s3400_s14 + $0x138] sm:$0xff]  ;;  %v2095_v45 = vld [vmem:[%s3400_s14 + $0xb0] sm:$0xff] }
 0x3ec   :  { %v647_v48 = vadd.f32 %v646_v46, %v645_v43  ;;  %v657_v49 = vrot.slane %v656_v47, 4  ;;  %v858_v43 = vld [vmem:[%s3400_s14 + $0x48] sm:$0xff]  ;;  %v857_v46 = vld [vmem:[%s3400_s14 + $0x40] sm:$0xff] }
 0x3ee   :  { %v648_v50 = vrot.slane %v647_v48, 2  ;;  %v658_v51 = vadd.f32 %v657_v49, %v656_v47  ;;  %v2128_v47 = vld [vmem:[%s3400_s14 + $0x130] sm:$0xff]  ;;  %v856_v49 = vld [vmem:[%s3400_s14 + $0x38] sm:$0xff] }
 0x3f0   :  { %v649_v52 = vadd.f32 %v648_v50, %v647_v48  ;;  %v659_v53 = vrot.slane %v658_v51, 2  ;;  %v2094_v48 = vld [vmem:[%s3400_s14 + $0xa8] sm:$0xff] }
 0x3f1   :  { %v2127_v50 = vld [vmem:[%s3400_s14 + $0x128] sm:$0xff] }
 0x3f2   :  { %v650_v54 = vrot.slane %v649_v52, 1  ;;  %v660_v55 = vadd.f32 %v659_v53, %v658_v51  ;;  %v2110_v51 = vld [vmem:[%s3399_s13 + $0x48] sm:$0xff]  ;;  %v2080_v53 = vld [vmem:[%s3399_s13 + $0x30] sm:$0xff] }
 0x3f4   :  { %v651_v56 = vadd.f32 %v650_v54, %v649_v52  ;;  %v661_v57 = vrot.slane %v660_v55, 1  ;;  %v2093_v52 = vld [vmem:[%s3400_s14 + $0xa0] sm:$0xff]  ;;  %v855_v54 = vld [vmem:[%s3400_s14 + $0x30] sm:$0xff] }
 0x3f6   :  { %2069 = vmatmul.msk.f32.vlgmr.msrb.gmra.mxu0 %vm641_vm8, %v651_v56  ;;  %v662_v58 = vadd.f32 %v661_v57, %v660_v55  ;;  %v802_v55 = vld [vmem:[%s3399_s13 + $0x18] sm:$0x3]  ;;  %v854_v57 = vld [vmem:[%s3400_s14 + $0x28] sm:$0xff] }
 0x3f7   :  { %v2092_v56 = vld [vmem:[%s3400_s14 + $0x98] sm:$0xff] }
 0x3f8   :  { %2070 = vmatmul.msk.f32.vlgmr.msrb.gmra.mxu2 %vm641_vm8, %v662_v58  ;;  %v2126_v58 = vld [vmem:[%s3400_s14 + $0x120] sm:$0xff] }
 0x473   :  { %v697_v61 = vpop.f32.mrf.mxu0 }
 0x474   :  { %v700_v62 = vmul.f32 0.010204081, %v697_v61  ;;  %v2125_v61 = vld [vmem:[%s3400_s14 + $0x118] sm:$0xff] }
 0x476   :  { %v725_v0 = vmul.f32 %v700_v62, %v700_v62 }
 0x47b   :  { %v721_v63 = vpop.f32.mrf.mxu2 }
 0x47c   :  { %v724_v1 = vmul.f32 0.010204081, %v721_v63  ;;  %v852_v63 = vld [vmem:[%s3400_s14 + $0x18] sm:$0xff] }
 0x47e   :  { %v726_v2 = vsub.f32 %v724_v1, %v725_v0  ;;  %v2124_v0 = vld [vmem:[%s3400_s14 + $0x110] sm:$0xff] }
 0x47f   :  { %v2111_v1 = vld [vmem:[%s3399_s13 + $0x50] sm:$0xff] }
 0x480   :  { %v728_v3 = vadd.f32 1e-05, %v726_v2  ;;  %v2089_v2 = vld [vmem:[%s3400_s14 + $0x80] sm:$0xff] }
 0x482   :  { %2271 = vrsqrt.f32 %v728_v3  ;;  %vm735_vm11 = vweird.f32 %v728_v3 }
 0x488   :  { %v2272_v4 = vpop.eup %2271 }
 0x489   :  { %v730_v5 = vmul.f32 %v2272_v4, %v728_v3  ;;  %vm736_vm10 = vweird.f32 %v2272_v4  ;;  %v2081_v3 = vld [vmem:[%s3399_s13 + $0x38] sm:$0x3] }
 0x48a   :  { %vm737_vm12 = vmor %vm735_vm11, %vm736_vm10 }
 0x48b   :  { %v731_v6 = vmul.f32 %v2272_v4, %v730_v5  ;;  %v2088_v5 = vld [vmem:[%s3400_s14 + $0x78] sm:$0xff] }
 0x48d   :  { %v732_v7 = vmul.f32 0.5, %v731_v6  ;;  %v2123_v6 = vld [vmem:[%s3400_s14 + $0x108] sm:$0xff] }
 0x48f   :  { %v733_v8 = vsub.f32 1.5, %v732_v7  ;;  %v850_v7 = vld [vmem:[%s3400_s14 + $0x8] sm:$0xff] }
 0x491   :  { %v734_v10 = vmul.f32 %v2272_v4, %v733_v8  ;;  %v2112_v8 = vld [vmem:[%s3399_s13 + $0x58] sm:$0x3] }
 0x493   :  { %v738_v11 = vsel %vm737_vm12, %v2272_v4, %v734_v10  ;;  %v851_v4 = vld [vmem:[%s3400_s14 + $0x10] sm:$0xff]  ;;  %v849_v10 = vld [vmem:[%s3400_s14] sm:$0xff] }
 0x494   :  { %v739_v12 = vmul.f32 %v738_v11, %v727_v9  ;;  %v2087_v9 = vld [vmem:[%s3400_s14 + $0x70] sm:$0xff]  ;;  %v2122_v11 = vld [vmem:[%s3400_s14 + $0x100] sm:$0xff] }
 0x496   :  { %2071 = vmatmul.msk.f32.vlgmr.msrb.gmra.mxu3 %vm128_vm2, %v739_v12  ;;  %v741_v13 = vmul.f32 %v739_v12, %v700_v62  ;;  %v2090_v62 = vld [vmem:[%s3400_s14 + $0x88] sm:$0xff]  ;;  %v2121_v12 = vld [vmem:[%s3400_s14 + $0xf8] sm:$0xff] }
 0x497   :  { %938 = vmatpush.msrb.mxu3 %v2100_v29  ;;  %v1155_v29 = vld [vmem:[%s3401_s15 + $0x58] sm:$0xff] }
 0x498   :  { %v742_v15 = vsub.f32 %v740_v14, %v741_v13  ;;  %v2120_v13 = vld [vmem:[%s3400_s14 + $0xf0] sm:$0xff]  ;;  %v2119_v14 = vld [vmem:[%s3400_s14 + $0xe8] sm:$0xff] }
 0x499   :  { %939 = vmatpush.msrb.mxu3 %v2099_v31  ;;  %v1153_v31 = vld [vmem:[%s3401_s15 + $0x48] sm:$0xff] }
 0x49e   :  { %2072 = vmatmul.msk.f32.vlgmr.msra.gmra.mxu3 %vm128_vm2, %v742_v15  ;;  %v2118_v15 = vld [vmem:[%s3400_s14 + $0xe0] sm:$0xff] }
 0x519   :  { %v765_v16 = vpop.f32.mrf.mxu3 }
 0x51a   :  { %v791_v17 = vperm.slane %v765_v16, 0 }
 0x51c   :  { %v792_v19 = vmul.f32 %v791_v17, %v2747_v33  ;;  %v793_v20 = vmul.f32 %v791_v17, %v640_v39  ;;  %v2098_v33 = vld [vmem:[%s3400_s14 + $0xc8] sm:$0xff] }
 0x51d   :  { %v2079_v39 = vld [vmem:[%s3399_s13 + $0x28] sm:$0xff]  ;;  %940 = vmatpush.msrb.mxu3 %v2098_v33  ;;  %v1151_v33 = vld [vmem:[%s3401_s15 + $0x38] sm:$0xff] }
 0x51f   :  { %941 = vmatpush.msrb.mxu3 %v2097_v38 }
 0x521   :  { %v788_v18 = vpop.f32.mrf.mxu3  ;;  %942 = vmatpush.msrb.mxu3 %v2096_v42 }
 0x522   :  { %v794_v21 = vperm.slane %v788_v18, 0 }
 0x523   :  { %943 = vmatpush.msrb.mxu3 %v2095_v45  ;;  %v1144_v45 = vld [vmem:[%s3401_s15] sm:$0xff] }
 0x524   :  { %v795_v22 = vadd.f32 %v794_v21, %v792_v19  ;;  %v796_v23 = vadd.f32 %v794_v21, %v793_v20 }
 0x525   :  { %944 = vmatpush.msrb.mxu3 %v2094_v48 }
 0x526   :  { %v798_v24 = vmax.f32 %v796_v23, 0.0  ;;  %v797_v25 = vmax.f32 %v795_v22, 0.0 }
 0x527   :  { %945 = vmatpush.msrb.mxu3 %v2093_v52 }
 0x528   :  { %2073 = vmatpush.msk.msra.mxu0 %vm816_vm13, %v798_v24  ;;  %2267 = vmatpush.msk.msra.mxu2 %vm816_vm13, %v798_v24 }
 0x529   :  { %2082 = vmatpush.msk.msrb.mxu1 %vm816_vm13, %v798_v24  ;;  %946 = vmatpush.msrb.mxu3 %v2092_v56 }
 0x52a   :  { %835 = vmatpush.msra.mxu0 %v797_v25  ;;  %2268 = vmatpush.msra.mxu2 %v797_v25 }
 0x52b   :  { %895 = vmatpush.msrb.mxu1 %v797_v25  ;;  %2074 = vmatmul.msk.f32.vlgmr.msra.gmra.mxu0 %vm803_vm14, %v799_v26 }
 0x52c   :  { %2083 = vmatmul.msk.f32.vlgmr.msrb.gmra.mxu1 %vm803_vm14, %v2078_v27  ;;  %2113 = vmatpush.msk.msrb.mxu0 %vm816_vm13, %v798_v24 }
 0x52d   :  { %2075 = vmatmul.msk.f32.vlgmr.msra.gmra.mxu2 %vm803_vm14, %v800_v28  ;;  %1081 = vmatpush.msra.mxu1 %v2131_v34  ;;  %v1156_v28 = vld [vmem:[%s3401_s15 + $0x60] sm:$0xff]  ;;  %v1150_v34 = vld [vmem:[%s3401_s15 + $0x30] sm:$0xff] }
 0x52e   :  { %1038 = vmatpush.msrb.mxu0 %v797_v25  ;;  %979 = vmatpush.msrb.mxu2 %v862_v30  ;;  %v1154_v30 = vld [vmem:[%s3401_s15 + $0x50] sm:$0xff] }
 0x52f   :  { %1082 = vmatpush.msra.mxu1 %v2130_v36  ;;  %947 = vmatpush.msrb.mxu3 %v2091_v59 }
 0x530   :  { %980 = vmatpush.msrb.mxu2 %v861_v32  ;;  %v1152_v32 = vld [vmem:[%s3401_s15 + $0x40] sm:$0xff] }
 0x531   :  { %1083 = vmatpush.msra.mxu1 %v2129_v44  ;;  %948 = vmatpush.msrb.mxu3 %v2090_v62  ;;  %v1145_v44 = vld [vmem:[%s3401_s15 + $0x8] sm:$0xff] }
 0x532   :  { %981 = vmatpush.msrb.mxu2 %v860_v35 }
 0x533   :  { %2114 = vmatmul.msk.f32.vlgmr.msrb.gmra.mxu0 %vm803_vm14, %v2109_v37  ;;  %1084 = vmatpush.msra.mxu1 %v2128_v47  ;;  %v1149_v37 = vld [vmem:[%s3401_s15 + $0x28] sm:$0xff] }
 0x534   :  { %2084 = vmatmul.msk.f32.gmra.mxu1 %vm803_vm14, %v2079_v39  ;;  %982 = vmatpush.msrb.mxu2 %v859_v40  ;;  %v1148_v39 = vld [vmem:[%s3401_s15 + $0x20] sm:$0xff]  ;;  %v1147_v40 = vld [vmem:[%s3401_s15 + $0x18] sm:$0xff] }
 0x535   :  { %2076 = vmatmul.msk.f32.gmra.mxu2 %vm803_vm14, %v801_v41  ;;  %1085 = vmatpush.msra.mxu1 %v2127_v50  ;;  %v1146_v41 = vld [vmem:[%s3401_s15 + $0x10] sm:$0xff] }
 0x536   :  { %983 = vmatpush.msrb.mxu2 %v858_v43  ;;  %949 = vmatpush.msrb.mxu3 %v2089_v2 }
 0x537   :  { %1086 = vmatpush.msra.mxu1 %v2126_v58 }
 0x538   :  { %984 = vmatpush.msrb.mxu2 %v857_v46  ;;  %950 = vmatpush.msrb.mxu3 %v2088_v5 }
 0x539   :  { %1087 = vmatpush.msra.mxu1 %v2125_v61 }
 0x53a   :  { %985 = vmatpush.msrb.mxu2 %v856_v49  ;;  %951 = vmatpush.msrb.mxu3 %v2087_v9 }
 0x53b   :  { %2115 = vmatmul.msk.f32.gmra.mxu0 %vm803_vm14, %v2110_v51  ;;  %1088 = vmatpush.msra.mxu1 %v2124_v0 }
 0x53c   :  { %2085 = vmatmul.msk.f32.gmra.mxu1 %vm803_vm14, %v2080_v53  ;;  %986 = vmatpush.msrb.mxu2 %v855_v54 }
 0x53d   :  { %2077 = vmatmul.msk.f32.gmra.mxu2 %vm803_vm14, %v802_v55  ;;  %1089 = vmatpush.msra.mxu1 %v2123_v6 }
 0x53e   :  { %987 = vmatpush.msrb.mxu2 %v854_v57  ;;  %1163 = vmatpush.msra.mxu3 %v1156_v28 }
 0x53f   :  { %1090 = vmatpush.msra.mxu1 %v2122_v11 }
 0x540   :  { %988 = vmatpush.msrb.mxu2 %v853_v60  ;;  %1164 = vmatpush.msra.mxu3 %v1155_v29 }
 0x541   :  { %1091 = vmatpush.msra.mxu1 %v2121_v12 }
 0x542   :  { %989 = vmatpush.msrb.mxu2 %v852_v63  ;;  %1165 = vmatpush.msra.mxu3 %v1154_v30 }
 0x543   :  { %2116 = vmatmul.msk.f32.gmra.mxu0 %vm803_vm14, %v2111_v1  ;;  %1092 = vmatpush.msra.mxu1 %v2120_v13 }
 0x544   :  { %2086 = vmatmul.msk.f32.gmra.mxu1 %vm803_vm14, %v2081_v3  ;;  %990 = vmatpush.msrb.mxu2 %v851_v4 }
 0x545   :  { %1093 = vmatpush.msra.mxu1 %v2119_v14  ;;  %1166 = vmatpush.msra.mxu3 %v1153_v31 }
 0x546   :  { %991 = vmatpush.msrb.mxu2 %v850_v7 }
 0x547   :  { %1094 = vmatpush.msra.mxu1 %v2118_v15  ;;  %1167 = vmatpush.msra.mxu3 %v1152_v32 }
 0x548   :  { %992 = vmatpush.msrb.mxu2 %v849_v10 }
 0x549   :  { %1168 = vmatpush.msra.mxu3 %v1151_v33 }
 0x54a   :  { %1187 = vmatpush.msra.mxu2 %v1156_v28 }
 0x54b   :  { %2117 = vmatmul.msk.f32.gmra.mxu0 %vm803_vm14, %v2112_v8  ;;  %1169 = vmatpush.msra.mxu3 %v1150_v34 }
 0x54c   :  { %1188 = vmatpush.msra.mxu2 %v1155_v29 }
 0x54d   :  { %1170 = vmatpush.msra.mxu3 %v1149_v37 }
 0x54e   :  { %1189 = vmatpush.msra.mxu2 %v1154_v30  ;;  %v2175_v30 = vld [vmem:[%s3403_s20 + $0xc8] sm:$0xff] }
 0x54f   :  { %1171 = vmatpush.msra.mxu3 %v1148_v39 }
 0x550   :  { %1190 = vmatpush.msra.mxu2 %v1153_v31  ;;  %v2174_v31 = vld [vmem:[%s3403_s20 + $0xc0] sm:$0xff] }
 0x551   :  { %1172 = vmatpush.msra.mxu3 %v1147_v40 }
 0x552   :  { %1191 = vmatpush.msra.mxu2 %v1152_v32 }
 0x553   :  { %1173 = vmatpush.msra.mxu3 %v1146_v41 }
 0x554   :  { %1192 = vmatpush.msra.mxu2 %v1151_v33 }
 0x555   :  { %1174 = vmatpush.msra.mxu3 %v1145_v44 }
 0x556   :  { %1193 = vmatpush.msra.mxu2 %v1150_v34 }
 0x557   :  { %1175 = vmatpush.msra.mxu3 %v1144_v45 }
 0x558   :  { %1194 = vmatpush.msra.mxu2 %v1149_v37  ;;  %v2172_v37 = vld [vmem:[%s3403_s20 + $0xb0] sm:$0xff] }
 0x55a   :  { %1195 = vmatpush.msra.mxu2 %v1148_v39 }
 0x55c   :  { %1196 = vmatpush.msra.mxu2 %v1147_v40 }
 0x55e   :  { %1197 = vmatpush.msra.mxu2 %v1146_v41 }
 0x560   :  { %1198 = vmatpush.msra.mxu2 %v1145_v44  ;;  %v1207_v44 = vld [vmem:[%s3404_s17] sm:$0x1] }
 0x562   :  { %1199 = vmatpush.msra.mxu2 %v1144_v45 }
 0x5a8   :  { %v837_v16 = vpop.f32.mrf.mxu0 }
 0x5a9   :  { %v897_v17 = vpop.f32.mrf.mxu1  ;;  %2105 = vmatmul.msk.f32.vlgmr.msrb.gmra.mxu2 %vm641_vm8, %v837_v16 }
 0x5aa   :  { %2101 = vmatmul.msk.f32.vlgmr.msrb.gmra.mxu3 %vm641_vm8, %v897_v17 }
 0x5b0   :  { %v840_v18 = vpop.f32.mrf.mxu2  ;;  %v1040_v19 = vpop.f32.mrf.mxu0 }
 0x5b1   :  { %v900_v20 = vpop.f32.mrf.mxu1  ;;  %2106 = vmatmul.msk.f32.gmra.mxu2 %vm641_vm8, %v840_v18  ;;  %2132 = vmatmul.msk.f32.vlgmr.msra.gmra.mxu1 %vm641_vm8, %v1040_v19 }
 0x5b2   :  { %2102 = vmatmul.msk.f32.gmra.mxu3 %vm641_vm8, %v900_v20 }
 0x5b8   :  { %v843_v21 = vpop.f32.mrf.mxu2  ;;  %v1043_v22 = vpop.f32.mrf.mxu0 }
 0x5b9   :  { %v903_v23 = vpop.f32.mrf.mxu1  ;;  %2107 = vmatmul.msk.f32.gmra.mxu2 %vm641_vm8, %v843_v21  ;;  %2133 = vmatmul.msk.f32.gmra.mxu1 %vm641_vm8, %v1043_v22 }
 0x5ba   :  { %2103 = vmatmul.msk.f32.gmra.mxu3 %vm641_vm8, %v903_v23 }
 0x5c0   :  { %v846_v24 = vpop.f32.mrf.mxu2  ;;  %v1046_v25 = vpop.f32.mrf.mxu0 }
 0x5c1   :  { %v906_v26 = vpop.f32.mrf.mxu1  ;;  %2108 = vmatmul.msk.f32.gmra.mxu2 %vm641_vm8, %v846_v24  ;;  %2134 = vmatmul.msk.f32.gmra.mxu1 %vm641_vm8, %v1046_v25 }
 0x5c2   :  { %2104 = vmatmul.msk.f32.gmra.mxu3 %vm641_vm8, %v906_v26 }
 0x5c8   :  { %v1049_v27 = vpop.f32.mrf.mxu0 }
 0x5c9   :  { %2135 = vmatmul.msk.f32.gmra.mxu1 %vm641_vm8, %v1049_v27  ;;  %v1223_v27 = vld [vmem:[%s3402_s16] sm:$0xff] }
 0x5ca   :  { %1242 = vmatpush.msra.mxu0 %v1223_v27  ;;  %1265 = vmatpush.msrb.mxu3 %v1223_v27  ;;  %v2191_v27 = vld [vmem:[%s3406_s19 + $0x78] sm:$0xff] }
 0x5cc   :  { %1472 = vmatpush.msrb.mxu0 %v2175_v30  ;;  %v1365_v30 = vld [vmem:[%s3403_s20 + $0x58] sm:$0xff] }
 0x5ce   :  { %1473 = vmatpush.msrb.mxu0 %v2174_v31  ;;  %v1364_v31 = vld [vmem:[%s3403_s20 + $0x50] sm:$0xff] }
 0x62c   :  { %v994_v35 = vpop.f32.mrf.mxu2 }
 0x62d   :  { %v953_v36 = vpop.f32.mrf.mxu3 }
 0x62e   :  { %v1096_v38 = vpop.f32.mrf.mxu1  ;;  %v995_v48 = vadd.f32 %v994_v35, %v953_v36  ;;  %v2173_v35 = vld [vmem:[%s3403_s20 + $0xb8] sm:$0xff] }
 0x62f   :  { %1474 = vmatpush.msrb.mxu0 %v2173_v35  ;;  %v1361_v35 = vld [vmem:[%s3403_s20 + $0x38] sm:$0xff] }
 0x630   :  { %v3002_v54 = vadd.f32 %v1096_v38, %v995_v48  ;;  %v1220_v48 = vld [vmem:[%s3405_s18] sm:$0x1] }
 0x631   :  { %1475 = vmatpush.msrb.mxu0 %v2172_v37  ;;  %v1359_v37 = vld [vmem:[%s3403_s20 + $0x28] sm:$0xff] }
 0x632   :  { %v1127_v57 = vmul.f32 %v3002_v54, %v3002_v54  ;;  %v1113_v62 = vsel %vm1112_vm15, %v3002_v54, 0.0 }
 0x634   :  { %v997_v42 = vpop.f32.mrf.mxu2  ;;  %v1131_v4 = vsel %vm1112_vm15, %v1127_v57, 0.0  ;;  %v2168_v57 = vld [vmem:[%s3403_s20 + $0x90] sm:$0xff] }
 0x635   :  { %v956_v43 = vpop.f32.mrf.mxu3 }
 0x636   :  { %v1099_v46 = vpop.f32.mrf.mxu1  ;;  %v998_v47 = vadd.f32 %v997_v42, %v956_v43 }
 0x638   :  { %v3000_v51 = vadd.f32 %v1099_v46, %v998_v47 }
 0x63a   :  { %v1128_v56 = vmul.f32 %v3000_v51, %v3000_v51  ;;  %v1114_v58 = vsel %vm1112_vm15, %v3000_v51, 0.0 }
 0x63b   :  { %v1115_v3 = vadd.f32 %v1114_v58, %v1113_v62  ;;  %v2167_v58 = vld [vmem:[%s3403_s20 + $0x88] sm:$0xff] }
 0x63c   :  { %v1000_v49 = vpop.f32.mrf.mxu2  ;;  %v1132_v63 = vsel %vm1112_vm15, %v1128_v56, 0.0  ;;  %v2169_v56 = vld [vmem:[%s3403_s20 + $0x98] sm:$0xff]  ;;  %v2163_v62 = vld [vmem:[%s3403_s20 + $0x68] sm:$0xff] }
 0x63d   :  { %v959_v50 = vpop.f32.mrf.mxu3  ;;  %v1133_v7 = vadd.f32 %v1132_v63, %v1131_v4 }
 0x63e   :  { %v1001_v52 = vadd.f32 %v1000_v49, %v959_v50  ;;  %v1102_v53 = vpop.f32.mrf.mxu1 }
 0x640   :  { %v3004_v55 = vadd.f32 %v1102_v53, %v1001_v52  ;;  %v2171_v52 = vld [vmem:[%s3403_s20 + $0xa8] sm:$0xff]  ;;  %v2170_v53 = vld [vmem:[%s3403_s20 + $0xa0] sm:$0xff] }
 0x641   :  { %1476 = vmatpush.msrb.mxu0 %v2171_v52 }
 0x642   :  { %v1129_v59 = vmul.f32 %v3004_v55, %v3004_v55  ;;  %v1116_v0 = vsel %vm1112_vm15, %v3004_v55, 0.0 }
 0x643   :  { %v1117_v8 = vadd.f32 %v1116_v0, %v1115_v3  ;;  %1477 = vmatpush.msrb.mxu0 %v2170_v53 }
 0x644   :  { %v1003_v60 = vpop.f32.mrf.mxu2  ;;  %v1134_v5 = vsel %vm1112_vm15, %v1129_v59, 0.0  ;;  %v2166_v59 = vld [vmem:[%s3403_s20 + $0x80] sm:$0xff] }
 0x645   :  { %v962_v61 = vpop.f32.mrf.mxu3  ;;  %v1135_v11 = vadd.f32 %v1134_v5, %v1133_v7  ;;  %1478 = vmatpush.msrb.mxu0 %v2169_v56  ;;  %v2213_v56 = vld [vmem:[%s3403_s20 + $0x110] sm:$0xff] }
 0x646   :  { %v1004_v1 = vadd.f32 %v1003_v60, %v962_v61  ;;  %v1105_v2 = vpop.f32.mrf.mxu1  ;;  %v2165_v60 = vld [vmem:[%s3403_s20 + $0x78] sm:$0xff]  ;;  %v2164_v61 = vld [vmem:[%s3403_s20 + $0x70] sm:$0xff] }
 0x647   :  { %1479 = vmatpush.msrb.mxu0 %v2168_v57  ;;  %v2212_v57 = vld [vmem:[%s3403_s20 + $0x108] sm:$0xff] }
 0x648   :  { %v3021_v6 = vadd.f32 %v1105_v2, %v1004_v1 }
 0x649   :  { %1480 = vmatpush.msrb.mxu0 %v2167_v58  ;;  %v2211_v58 = vld [vmem:[%s3403_s20 + $0x100] sm:$0xff] }
 0x64a   :  { %v1119_v9 = vsel %vm1118_vm1, %v3021_v6, 0.0  ;;  %v1130_v10 = vmul.f32 %v3021_v6, %v3021_v6 }
 0x64b   :  { %v1120_v12 = vadd.f32 %v1119_v9, %v1117_v8  ;;  %1481 = vmatpush.msrb.mxu0 %v2166_v59  ;;  %v2210_v59 = vld [vmem:[%s3403_s20 + $0xf8] sm:$0xff] }
 0x64c   :  { %v1136_v13 = vsel %vm1118_vm1, %v1130_v10, 0.0 }
 0x64d   :  { %v1121_v14 = vrot.slane %v1120_v12, 4  ;;  %v1137_v15 = vadd.f32 %v1136_v13, %v1135_v11  ;;  %1482 = vmatpush.msrb.mxu0 %v2165_v60 }
 0x64f   :  { %v1122_v16 = vadd.f32 %v1121_v14, %v1120_v12  ;;  %v1138_v17 = vrot.slane %v1137_v15, 4  ;;  %1483 = vmatpush.msrb.mxu0 %v2164_v61  ;;  %v1285_v14 = vld [vmem:[%s3406_s19 + $0x8] sm:$0xff] }
 0x651   :  { %v1123_v18 = vrot.slane %v1122_v16, 2  ;;  %v1139_v19 = vadd.f32 %v1138_v17, %v1137_v15  ;;  %1484 = vmatpush.msrb.mxu0 %v2163_v62  ;;  %v2149_v15 = vld [vmem:[%s3406_s19 + $0x40] sm:$0xff]  ;;  %v2150_v17 = vld [vmem:[%s3406_s19 + $0x48] sm:$0xff]  ;;  %v2209_v62 = vld [vmem:[%s3403_s20 + $0xf0] sm:$0xff] }
 0x653   :  { %v1124_v20 = vadd.f32 %v1123_v18, %v1122_v16  ;;  %v1140_v21 = vrot.slane %v1139_v19, 2  ;;  %v1286_v16 = vld [vmem:[%s3406_s19 + $0x10] sm:$0xff]  ;;  %v1287_v18 = vld [vmem:[%s3406_s19 + $0x18] sm:$0xff] }
 0x655   :  { %v1125_v22 = vrot.slane %v1124_v20, 1  ;;  %v1141_v23 = vadd.f32 %v1140_v21, %v1139_v19  ;;  %v2151_v19 = vld [vmem:[%s3406_s19 + $0x50] sm:$0xff]  ;;  %v2152_v21 = vld [vmem:[%s3406_s19 + $0x58] sm:$0xff] }
 0x657   :  { %v1126_v24 = vadd.f32 %v1125_v22, %v1124_v20  ;;  %v1142_v25 = vrot.slane %v1141_v23, 1  ;;  %v1288_v20 = vld [vmem:[%s3406_s19 + $0x20] sm:$0xff]  ;;  %v1289_v22 = vld [vmem:[%s3406_s19 + $0x28] sm:$0xff] }
 0x659   :  { %2136 = vmatmul.msk.f32.vlgmr.msra.gmra.mxu3 %vm1112_vm15, %v1126_v24  ;;  %v1143_v26 = vadd.f32 %v1142_v25, %v1141_v23  ;;  %v2153_v23 = vld [vmem:[%s3406_s19 + $0x60] sm:$0xff]  ;;  %v1290_v24 = vld [vmem:[%s3406_s19 + $0x30] sm:$0xff]  ;;  %v2154_v25 = vld [vmem:[%s3406_s19 + $0x68] sm:$0xff] }
 0x65b   :  { %2137 = vmatmul.msk.f32.vlgmr.msra.gmra.mxu2 %vm1112_vm15, %v1143_v26  ;;  %v2190_v26 = vld [vmem:[%s3406_s19 + $0x70] sm:$0xff] }
 0x6dc   :  { %v1177_v28 = vpop.f32.mrf.mxu3 }
 0x6dd   :  { %v1180_v29 = vmul.f32 0.00295858, %v1177_v28  ;;  %v2192_v28 = vld [vmem:[%s3406_s19 + $0x80] sm:$0xff] }
 0x6de   :  { %v1201_v32 = vpop.f32.mrf.mxu2 }
 0x6df   :  { %v1205_v33 = vmul.f32 %v1180_v29, %v1180_v29  ;;  %v1204_v34 = vmul.f32 0.00295858, %v1201_v32  ;;  %v1363_v32 = vld [vmem:[%s3403_s20 + $0x48] sm:$0xff] }
 0x6e1   :  { %v1206_v36 = vsub.f32 %v1204_v34, %v1205_v33  ;;  %v1362_v33 = vld [vmem:[%s3403_s20 + $0x40] sm:$0xff]  ;;  %v2193_v34 = vld [vmem:[%s3406_s19 + $0x88] sm:$0xff] }
 0x6e3   :  { %v1208_v38 = vadd.f32 1e-05, %v1206_v36  ;;  %v1360_v36 = vld [vmem:[%s3403_s20 + $0x30] sm:$0xff] }
 0x6e5   :  { %2273 = vrsqrt.f32 %v1208_v38  ;;  %vm1215_vm3 = vweird.f32 %v1208_v38 }
 0x6eb   :  { %v2274_v39 = vpop.eup %2273 }
 0x6ec   :  { %v1210_v40 = vmul.f32 %v2274_v39, %v1208_v38  ;;  %vm1216_vm2 = vweird.f32 %v2274_v39  ;;  %v2194_v38 = vld [vmem:[%s3406_s19 + $0x90] sm:$0xff] }
 0x6ed   :  { %vm1217_vm4 = vmor %vm1215_vm3, %vm1216_vm2 }
 0x6ee   :  { %v1211_v41 = vmul.f32 %v2274_v39, %v1210_v40  ;;  %v1357_v40 = vld [vmem:[%s3403_s20 + $0x18] sm:$0xff] }
 0x6f0   :  { %v1212_v42 = vmul.f32 0.5, %v1211_v41  ;;  %v1356_v41 = vld [vmem:[%s3403_s20 + $0x10] sm:$0xff] }
 0x6f2   :  { %v1213_v43 = vsub.f32 1.5, %v1212_v42  ;;  %v1355_v42 = vld [vmem:[%s3403_s20 + $0x8] sm:$0xff] }
 0x6f4   :  { %v1214_v45 = vmul.f32 %v2274_v39, %v1213_v43  ;;  %v2195_v43 = vld [vmem:[%s3406_s19 + $0x98] sm:$0xff] }
 0x6f6   :  { %v1218_v46 = vsel %vm1217_vm4, %v2274_v39, %v1214_v45  ;;  %v1358_v39 = vld [vmem:[%s3403_s20 + $0x20] sm:$0xff] }
 0x6f7   :  { %v1219_v47 = vmul.f32 %v1218_v46, %v1207_v44  ;;  %v1354_v44 = vld [vmem:[%s3403_s20] sm:$0xff] }
 0x6f8   :  { %v2196_v45 = vld [vmem:[%s3406_s19 + $0xa0] sm:$0xff] }
 0x6f9   :  { %v1221_v49 = vmul.f32 %v1219_v47, %v1180_v29  ;;  %2138 = vmatmul.msk.f32.vlgmr.msra.gmra.mxu0 %vm426_vm7, %v1219_v47  ;;  %v1366_v29 = vld [vmem:[%s3403_s20 + $0x60] sm:$0xff]  ;;  %v2217_v47 = vld [vmem:[%s3403_s20 + $0x130] sm:$0xff] }
 0x6fa   :  { %1531 = vmatpush.msra.mxu3 %v1366_v29  ;;  %v2247_v29 = vld [vmem:[%s3403_s20 + $0x170] sm:$0xff] }
 0x6fb   :  { %v1222_v50 = vsub.f32 %v1220_v48, %v1221_v49  ;;  %v2216_v48 = vld [vmem:[%s3403_s20 + $0x128] sm:$0xff]  ;;  %v2215_v49 = vld [vmem:[%s3403_s20 + $0x120] sm:$0xff] }
 0x6fc   :  { %1532 = vmatpush.msra.mxu3 %v1365_v30 }
 0x6fd   :  { %2139 = vmatmul.msk.f32.vlgmr.msrb.gmra.mxu3 %vm426_vm7, %v1222_v50  ;;  %v2214_v50 = vld [vmem:[%s3403_s20 + $0x118] sm:$0xff] }
 0x6fe   :  { %1533 = vmatpush.msra.mxu3 %v1364_v31  ;;  %v2246_v31 = vld [vmem:[%s3403_s20 + $0x168] sm:$0xff] }
 0x700   :  { %1534 = vmatpush.msra.mxu3 %v1363_v32  ;;  %v2245_v32 = vld [vmem:[%s3403_s20 + $0x160] sm:$0xff] }
 0x702   :  { %1535 = vmatpush.msra.mxu3 %v1362_v33  ;;  %v2244_v33 = vld [vmem:[%s3403_s20 + $0x158] sm:$0xff] }
 0x704   :  { %1536 = vmatpush.msra.mxu3 %v1361_v35  ;;  %v2243_v35 = vld [vmem:[%s3403_s20 + $0x150] sm:$0xff] }
 0x706   :  { %1537 = vmatpush.msra.mxu3 %v1360_v36  ;;  %v2242_v36 = vld [vmem:[%s3403_s20 + $0x148] sm:$0xff] }
 0x708   :  { %1538 = vmatpush.msra.mxu3 %v1359_v37  ;;  %v2241_v37 = vld [vmem:[%s3403_s20 + $0x140] sm:$0xff] }
 0x70a   :  { %1539 = vmatpush.msra.mxu3 %v1358_v39 }
 0x70c   :  { %1540 = vmatpush.msra.mxu3 %v1357_v40 }
 0x70e   :  { %1541 = vmatpush.msra.mxu3 %v1356_v41 }
 0x710   :  { %1542 = vmatpush.msra.mxu3 %v1355_v42 }
 0x712   :  { %1543 = vmatpush.msra.mxu3 %v1354_v44 }
 0x776   :  { %v1244_v63 = vpop.f32.mrf.mxu0 }
 0x777   :  { %v1270_v0 = vperm.slane %v1244_v63, 0  ;;  %v2208_v63 = vld [vmem:[%s3403_s20 + $0xe8] sm:$0xff] }
 0x779   :  { %v1273_v2 = vmul.f32 %v1270_v0, %v3004_v55  ;;  %v1274_v3 = vmul.f32 %v1270_v0, %v3021_v6  ;;  %v1272_v5 = vmul.f32 %v1270_v0, %v3000_v51  ;;  %v1271_v9 = vmul.f32 %v1270_v0, %v3002_v54  ;;  %v1284_v54 = vld [vmem:[%s3406_s19] sm:$0xff]  ;;  %v2148_v6 = vld [vmem:[%s3406_s19 + $0x38] sm:$0xff] }
 0x77a   :  { %v2207_v0 = vld [vmem:[%s3403_s20 + $0xe0] sm:$0xff] }
 0x780   :  { %v1267_v1 = vpop.f32.mrf.mxu3 }
 0x781   :  { %v1275_v4 = vperm.slane %v1267_v1, 0  ;;  %v2206_v1 = vld [vmem:[%s3403_s20 + $0xd8] sm:$0xff] }
 0x783   :  { %v1279_v7 = vadd.f32 %v1275_v4, %v1274_v3  ;;  %v1278_v8 = vadd.f32 %v1275_v4, %v1273_v2  ;;  %v1277_v11 = vadd.f32 %v1275_v4, %v1272_v5  ;;  %v1276_v13 = vadd.f32 %v1275_v4, %v1271_v9  ;;  %v2205_v4 = vld [vmem:[%s3403_s20 + $0xd0] sm:$0xff] }
 0x785   :  { %v1283_v10 = vmax.f32 %v1279_v7, 0.0  ;;  %v1282_v12 = vmax.f32 %v1278_v8, 0.0  ;;  %v1281_v55 = vmax.f32 %v1277_v11, 0.0  ;;  %v1280_v51 = vmax.f32 %v1276_v13, 0.0 }
 0x787   :  { %2140 = vmatpush.msk.msrb.mxu1 %vm74_vm0, %v1283_v10  ;;  %2155 = vmatpush.msk.msrb.mxu2 %vm74_vm0, %v1283_v10 }
 0x788   :  { %2232 = vmatpush.msk.msra.mxu0 %vm74_vm0, %v1283_v10 }
 0x789   :  { %1329 = vmatpush.msrb.mxu1 %v1282_v12  ;;  %1409 = vmatpush.msrb.mxu2 %v1282_v12 }
 0x78a   :  { %1755 = vmatpush.msra.mxu0 %v1282_v12 }
 0x78b   :  { %1330 = vmatpush.msrb.mxu1 %v1281_v55  ;;  %1410 = vmatpush.msrb.mxu2 %v1281_v55 }
 0x78c   :  { %1756 = vmatpush.msra.mxu0 %v1281_v55 }
 0x78d   :  { %1331 = vmatpush.msrb.mxu1 %v1280_v51  ;;  %1411 = vmatpush.msrb.mxu2 %v1280_v51 }
 0x78e   :  { %1757 = vmatpush.msra.mxu0 %v1280_v51  ;;  %2141 = vmatmul.msk.f32.vlgmr.msrb.gmra.mxu1 %vm1291_vm5, %v1284_v54  ;;  %v2226_v54 = vld [vmem:[%s3406_s19 + $0xb0] sm:$0xff] }
 0x78f   :  { %2156 = vmatmul.msk.f32.vlgmr.msrb.gmra.mxu2 %vm1291_vm5, %v2148_v6  ;;  %2197 = vmatpush.msk.msra.mxu1 %vm74_vm0, %v1283_v10 }
 0x790   :  { %1671 = vmatpush.msra.mxu2 %v2217_v47 }
 0x791   :  { %1608 = vmatpush.msra.mxu1 %v1282_v12 }
 0x792   :  { %1672 = vmatpush.msra.mxu2 %v2216_v48 }
 0x793   :  { %1609 = vmatpush.msra.mxu1 %v1281_v55  ;;  %v2225_v55 = vld [vmem:[%s3406_s19 + $0xa8] sm:$0xff] }
 0x794   :  { %1673 = vmatpush.msra.mxu2 %v2215_v49 }
 0x795   :  { %1610 = vmatpush.msra.mxu1 %v1280_v51 }
 0x796   :  { %2142 = vmatmul.msk.f32.gmra.mxu1 %vm1291_vm5, %v1285_v14  ;;  %1674 = vmatpush.msra.mxu2 %v2214_v50  ;;  %v2227_v14 = vld [vmem:[%s3406_s19 + $0xb8] sm:$0xff] }
 0x797   :  { %2157 = vmatmul.msk.f32.gmra.mxu2 %vm1291_vm5, %v2149_v15 }
 0x798   :  { %1675 = vmatpush.msra.mxu2 %v2213_v56 }
 0x79a   :  { %1676 = vmatpush.msra.mxu2 %v2212_v57 }
 0x79c   :  { %1677 = vmatpush.msra.mxu2 %v2211_v58 }
 0x79e   :  { %2143 = vmatmul.msk.f32.gmra.mxu1 %vm1291_vm5, %v1286_v16  ;;  %1678 = vmatpush.msra.mxu2 %v2210_v59  ;;  %v2228_v16 = vld [vmem:[%s3406_s19 + $0xc0] sm:$0xff] }
 0x79f   :  { %2158 = vmatmul.msk.f32.gmra.mxu2 %vm1291_vm5, %v2150_v17 }
 0x7a0   :  { %1679 = vmatpush.msra.mxu2 %v2209_v62 }
 0x7a2   :  { %1680 = vmatpush.msra.mxu2 %v2208_v63 }
 0x7a4   :  { %1681 = vmatpush.msra.mxu2 %v2207_v0 }
 0x7a6   :  { %2144 = vmatmul.msk.f32.gmra.mxu1 %vm1291_vm5, %v1287_v18  ;;  %1682 = vmatpush.msra.mxu2 %v2206_v1  ;;  %v2229_v18 = vld [vmem:[%s3406_s19 + $0xc8] sm:$0xff] }
 0x7a7   :  { %2159 = vmatmul.msk.f32.gmra.mxu2 %vm1291_vm5, %v2151_v19 }
 0x7a8   :  { %1683 = vmatpush.msra.mxu2 %v2205_v4 }
 0x7ae   :  { %2145 = vmatmul.msk.f32.gmra.mxu1 %vm1291_vm5, %v1288_v20  ;;  %v2230_v20 = vld [vmem:[%s3406_s19 + $0xd0] sm:$0xff] }
 0x7af   :  { %2160 = vmatmul.msk.f32.gmra.mxu2 %vm1291_vm5, %v2152_v21 }
 0x7b6   :  { %2146 = vmatmul.msk.f32.gmra.mxu1 %vm1291_vm5, %v1289_v22  ;;  %v2231_v22 = vld [vmem:[%s3406_s19 + $0xd8] sm:$0xff] }
 0x7b7   :  { %2161 = vmatmul.msk.f32.gmra.mxu2 %vm1291_vm5, %v2153_v23  ;;  %v2252_v23 = vld [vmem:[%s3403_s20 + $0x198] sm:$0xff] }
 0x7b8   :  { %1818 = vmatpush.msrb.mxu3 %v2252_v23 }
 0x7be   :  { %2147 = vmatmul.msk.f32.gmra.mxu1 %vm1291_vm5, %v1290_v24  ;;  %v2251_v24 = vld [vmem:[%s3403_s20 + $0x190] sm:$0xff] }
 0x7bf   :  { %2162 = vmatmul.msk.f32.gmra.mxu2 %vm1291_vm5, %v2154_v25  ;;  %v2250_v25 = vld [vmem:[%s3403_s20 + $0x188] sm:$0xff]  ;;  %1819 = vmatpush.msrb.mxu3 %v2251_v24 }
 0x7c1   :  { %1820 = vmatpush.msrb.mxu3 %v2250_v25 }
 0x7c6   :  { %2198 = vmatmul.msk.f32.vlgmr.msra.gmra.mxu1 %vm1291_vm5, %v2190_v26  ;;  %v2249_v26 = vld [vmem:[%s3403_s20 + $0x180] sm:$0xff] }
 0x7c7   :  { %1821 = vmatpush.msrb.mxu3 %v2249_v26 }
 0x7ce   :  { %2199 = vmatmul.msk.f32.gmra.mxu1 %vm1291_vm5, %v2191_v27 }
 0x7d6   :  { %2200 = vmatmul.msk.f32.gmra.mxu1 %vm1291_vm5, %v2192_v28  ;;  %v2248_v28 = vld [vmem:[%s3403_s20 + $0x178] sm:$0xff] }
 0x7d7   :  { %1822 = vmatpush.msrb.mxu3 %v2248_v28 }
 0x7d9   :  { %1823 = vmatpush.msrb.mxu3 %v2247_v29 }
 0x7db   :  { %1824 = vmatpush.msrb.mxu3 %v2246_v31 }
 0x7dd   :  { %1825 = vmatpush.msrb.mxu3 %v2245_v32 }
 0x7de   :  { %2201 = vmatmul.msk.f32.gmra.mxu1 %vm1291_vm5, %v2193_v34 }
 0x7df   :  { %1826 = vmatpush.msrb.mxu3 %v2244_v33 }
 0x7e1   :  { %1827 = vmatpush.msrb.mxu3 %v2243_v35 }
 0x7e3   :  { %1828 = vmatpush.msrb.mxu3 %v2242_v36 }
 0x7e5   :  { %1829 = vmatpush.msrb.mxu3 %v2241_v37 }
 0x7e6   :  { %2202 = vmatmul.msk.f32.gmra.mxu1 %vm1291_vm5, %v2194_v38  ;;  %v2240_v38 = vld [vmem:[%s3403_s20 + $0x138] sm:$0xff] }
 0x7e7   :  { %1830 = vmatpush.msrb.mxu3 %v2240_v38 }
 0x7ee   :  { %2203 = vmatmul.msk.f32.gmra.mxu1 %vm1291_vm5, %v2195_v43 }
 0x7f6   :  { %2204 = vmatmul.msk.f32.gmra.mxu1 %vm1291_vm5, %v2196_v45 }
 0x80b   :  { %v1333_v46 = vpop.f32.mrf.mxu1 }
 0x80c   :  { %2183 = vmatmul.msk.f32.vlgmr.msra.gmra.mxu3 %vm1112_vm15, %v1333_v46 }
 0x812   :  { %v1413_v52 = vpop.f32.mrf.mxu2 }
 0x813   :  { %2176 = vmatmul.msk.f32.vlgmr.msrb.gmra.mxu0 %vm1112_vm15, %v1413_v52  ;;  %v1336_v53 = vpop.f32.mrf.mxu1 }
 0x814   :  { %2184 = vmatmul.msk.f32.gmra.mxu3 %vm1112_vm15, %v1336_v53 }
 0x81a   :  { %v1416_v60 = vpop.f32.mrf.mxu2 }
 0x81b   :  { %2177 = vmatmul.msk.f32.gmra.mxu0 %vm1112_vm15, %v1416_v60  ;;  %v1339_v61 = vpop.f32.mrf.mxu1 }
 0x81c   :  { %2185 = vmatmul.msk.f32.gmra.mxu3 %vm1112_vm15, %v1339_v61 }
 0x822   :  { %v1419_v2 = vpop.f32.mrf.mxu2 }
 0x823   :  { %2178 = vmatmul.msk.f32.gmra.mxu0 %vm1112_vm15, %v1419_v2  ;;  %v1342_v3 = vpop.f32.mrf.mxu1 }
 0x824   :  { %2186 = vmatmul.msk.f32.gmra.mxu3 %vm1112_vm15, %v1342_v3 }
 0x82a   :  { %v1422_v5 = vpop.f32.mrf.mxu2 }
 0x82b   :  { %2179 = vmatmul.msk.f32.gmra.mxu0 %vm1112_vm15, %v1422_v5  ;;  %v1345_v7 = vpop.f32.mrf.mxu1 }
 0x82c   :  { %2187 = vmatmul.msk.f32.gmra.mxu3 %vm1112_vm15, %v1345_v7 }
 0x832   :  { %v1425_v8 = vpop.f32.mrf.mxu2 }
 0x833   :  { %2180 = vmatmul.msk.f32.gmra.mxu0 %vm1112_vm15, %v1425_v8  ;;  %v1348_v9 = vpop.f32.mrf.mxu1 }
 0x834   :  { %2188 = vmatmul.msk.f32.gmra.mxu3 %vm1112_vm15, %v1348_v9 }
 0x83a   :  { %v1428_v10 = vpop.f32.mrf.mxu2 }
 0x83b   :  { %2181 = vmatmul.msk.f32.gmra.mxu0 %vm1112_vm15, %v1428_v10  ;;  %v1351_v11 = vpop.f32.mrf.mxu1 }
 0x83c   :  { %2189 = vmatmul.msk.f32.gmra.mxu3 %vm1112_vm15, %v1351_v11 }
 0x842   :  { %v1431_v12 = vpop.f32.mrf.mxu2 }
 0x843   :  { %2182 = vmatmul.msk.f32.gmra.mxu0 %vm1112_vm15, %v1431_v12  ;;  %v1612_v13 = vpop.f32.mrf.mxu1 }
 0x844   :  { %2218 = vmatmul.msk.f32.vlgmr.msra.gmra.mxu2 %vm1112_vm15, %v1612_v13 }
 0x84b   :  { %2233 = vmatmul.msk.f32.vlgmr.msra.gmra.mxu0 %vm1291_vm5, %v2225_v55  ;;  %v1615_v51 = vpop.f32.mrf.mxu1 }
 0x84c   :  { %2219 = vmatmul.msk.f32.gmra.mxu2 %vm1112_vm15, %v1615_v51 }
 0x853   :  { %2234 = vmatmul.msk.f32.gmra.mxu0 %vm1291_vm5, %v2226_v54  ;;  %v1618_v6 = vpop.f32.mrf.mxu1 }
 0x854   :  { %2220 = vmatmul.msk.f32.gmra.mxu2 %vm1112_vm15, %v1618_v6 }
 0x85b   :  { %2235 = vmatmul.msk.f32.gmra.mxu0 %vm1291_vm5, %v2227_v14  ;;  %v1621_v15 = vpop.f32.mrf.mxu1 }
 0x85c   :  { %2221 = vmatmul.msk.f32.gmra.mxu2 %vm1112_vm15, %v1621_v15 }
 0x863   :  { %2236 = vmatmul.msk.f32.gmra.mxu0 %vm1291_vm5, %v2228_v16  ;;  %v1624_v17 = vpop.f32.mrf.mxu1 }
 0x864   :  { %2222 = vmatmul.msk.f32.gmra.mxu2 %vm1112_vm15, %v1624_v17 }
 0x86b   :  { %2237 = vmatmul.msk.f32.gmra.mxu0 %vm1291_vm5, %v2229_v18  ;;  %v1627_v19 = vpop.f32.mrf.mxu1 }
 0x86c   :  { %2223 = vmatmul.msk.f32.gmra.mxu2 %vm1112_vm15, %v1627_v19 }
 0x873   :  { %2238 = vmatmul.msk.f32.gmra.mxu0 %vm1291_vm5, %v2230_v20  ;;  %v1630_v21 = vpop.f32.mrf.mxu1 }
 0x874   :  { %2224 = vmatmul.msk.f32.gmra.mxu2 %vm1112_vm15, %v1630_v21 }
 0x87b   :  { %2239 = vmatmul.msk.f32.gmra.mxu0 %vm1291_vm5, %v2231_v22 }
 0x88f   :  { %v1545_v50 = vpop.f32.mrf.mxu3 }
 0x890   :  { %v1486_v27 = vpop.f32.mrf.mxu0 }
 0x891   :  { %v1546_v62 = vadd.f32 %v1545_v50, %v1486_v27 }
 0x897   :  { %v1548_v52 = vpop.f32.mrf.mxu3 }
 0x898   :  { %v1489_v30 = vpop.f32.mrf.mxu0 }
 0x899   :  { %v1549_v4 = vadd.f32 %v1548_v52, %v1489_v30 }
 0x89f   :  { %v1551_v53 = vpop.f32.mrf.mxu3 }
 0x8a0   :  { %v1492_v34 = vpop.f32.mrf.mxu0 }
 0x8a1   :  { %v1552_v12 = vadd.f32 %v1551_v53, %v1492_v34 }
 0x8a7   :  { %v1554_v56 = vpop.f32.mrf.mxu3 }
 0x8a8   :  { %v1495_v39 = vpop.f32.mrf.mxu0 }
 0x8a9   :  { %v1555_v17 = vadd.f32 %v1554_v56, %v1495_v39 }
 0x8af   :  { %v1557_v57 = vpop.f32.mrf.mxu3 }
 0x8b0   :  { %v3336_v40 = vpop.f32.mrf.mxu0 }
 0x8b1   :  { %v1558_v31 = vadd.f32 %v1557_v57, %v3336_v40 }
 0x8b7   :  { %v3349_v58 = vpop.f32.mrf.mxu3 }
 0x8b8   :  { %v3338_v41 = vpop.f32.mrf.mxu0 }
 0x8b9   :  { %v1561_v52 = vadd.f32 %v3349_v58, %v3338_v41 }
 0x8bf   :  { %v3351_v60 = vpop.f32.mrf.mxu3 }
 0x8c0   :  { %v3340_v42 = vpop.f32.mrf.mxu0 }
 0x8c7   :  { %v1685_v59 = vpop.f32.mrf.mxu2 }
 0x8c8   :  { %v1759_v43 = vpop.f32.mrf.mxu0  ;;  %v1706_v63 = vadd.f32 %v1685_v59, %v1546_v62 }
 0x8c9   :  { %2253 = vmatmul.msk.f32.vlgmr.msrb.gmra.mxu3 %vm1112_vm15, %v1759_v43 }
 0x8cf   :  { %v1688_v61 = vpop.f32.mrf.mxu2 }
 0x8d0   :  { %v1762_v44 = vpop.f32.mrf.mxu0  ;;  %v1707_v5 = vadd.f32 %v1688_v61, %v1549_v4 }
 0x8d1   :  { %2254 = vmatmul.msk.f32.gmra.mxu3 %vm1112_vm15, %v1762_v44 }
 0x8d7   :  { %v1691_v3 = vpop.f32.mrf.mxu2 }
 0x8d8   :  { %v1765_v45 = vpop.f32.mrf.mxu0  ;;  %v1708_v55 = vadd.f32 %v1691_v3, %v1552_v12 }
 0x8d9   :  { %2255 = vmatmul.msk.f32.gmra.mxu3 %vm1112_vm15, %v1765_v45 }
 0x8df   :  { %v1694_v13 = vpop.f32.mrf.mxu2 }
 0x8e0   :  { %v1768_v46 = vpop.f32.mrf.mxu0  ;;  %v1709_v19 = vadd.f32 %v1694_v13, %v1555_v17 }
 0x8e1   :  { %2256 = vmatmul.msk.f32.gmra.mxu3 %vm1112_vm15, %v1768_v46 }
 0x8e7   :  { %v1697_v21 = vpop.f32.mrf.mxu2 }
 0x8e8   :  { %v1771_v47 = vpop.f32.mrf.mxu0  ;;  %v1710_v37 = vadd.f32 %v1697_v21, %v1558_v31 }
 0x8e9   :  { %2257 = vmatmul.msk.f32.gmra.mxu3 %vm1112_vm15, %v1771_v47 }
 0x8ef   :  { %v1700_v46 = vpop.f32.mrf.mxu2 }
 0x8f0   :  { %v1774_v48 = vpop.f32.mrf.mxu0  ;;  %v1711_v62 = vadd.f32 %v1700_v46, %v1561_v52 }
 0x8f1   :  { %2258 = vmatmul.msk.f32.gmra.mxu3 %vm1112_vm15, %v1774_v48 }
 0x8f8   :  { %v1777_v49 = vpop.f32.mrf.mxu0 }
 0x8f9   :  { %2259 = vmatmul.msk.f32.gmra.mxu3 %vm1112_vm15, %v1777_v49 }
 0x94c   :  { %v1832_v0 = vpop.f32.mrf.mxu3 }
 0x94d   :  { %v1853_v1 = vadd.f32 %v1832_v0, %v1706_v63 }
 0x94f   :  { %v2260_v2 = vmul.f32 -1.442695, %v1853_v1 }
 0x951   :  { %2275 = vpow2.f32 %v2260_v2 }
 0x954   :  { %v1835_v7 = vpop.f32.mrf.mxu3 }
 0x955   :  { %v1854_v8 = vadd.f32 %v1835_v7, %v1707_v5 }
 0x957   :  { %v2276_v9 = vpop.eup %2275  ;;  %v2261_v10 = vmul.f32 -1.442695, %v1854_v8  ;;  %v1564_v8 = vadd.f32 %v3351_v60, %v3340_v42 }
 0x958   :  { %v1881_v11 = vadd.f32 1.0, %v2276_v9  ;;  %v1703_v9 = vpop.f32.mrf.mxu2 }
 0x959   :  { %2277 = vpow2.f32 %v2261_v10 }
 0x95a   :  { %2279 = vrcp.f32 %v1881_v11  ;;  %v1899_v22 = vand.u32 2147483648, %v1881_v11  ;;  %v1897_v25 = vand.u32 2147483647, %v1881_v11  ;;  %vm1893_vm6 = vweird.f32 %v1881_v11 }
 0x95c   :  { %v1838_v51 = vpop.f32.mrf.mxu3  ;;  %v1900_v32 = vor.u32 1.1754944e-38, %v1899_v22  ;;  %vm1898_vm9 = vcmp.eq.f32.partialorder %v1897_v25, 8.507059e+37 }
 0x95d   :  { %v1855_v54 = vadd.f32 %v1838_v51, %v1708_v55  ;;  %v1712_v51 = vadd.f32 %v1703_v9, %v1564_v8 }
 0x95f   :  { %v2278_v6 = vpop.eup %2277  ;;  %v2262_v14 = vmul.f32 -1.442695, %v1855_v54 }
 0x960   :  { %v2280_v15 = vpop.eup %2279  ;;  %v1882_v16 = vadd.f32 1.0, %v2278_v6 }
 0x961   :  { %v1889_v18 = vmul.f32 %v2280_v15, %v1881_v11  ;;  %2281 = vpow2.f32 %v2262_v14  ;;  %vm1894_vm0 = vweird.f32 %v2280_v15 }
 0x962   :  { %2283 = vrcp.f32 %v1882_v16  ;;  %vm1895_vm7 = vmor %vm1893_vm6, %vm1894_vm0  ;;  %v1914_v39 = vand.u32 2147483648, %v1882_v16  ;;  %v1912_v40 = vand.u32 2147483647, %v1882_v16  ;;  %vm1908_vm11 = vweird.f32 %v1882_v16 }
 0x963   :  { %v1890_v20 = vsub.f32 1.0, %v1889_v18 }
 0x964   :  { %v1841_v23 = vpop.f32.mrf.mxu3  ;;  %v1915_v53 = vor.u32 1.1754944e-38, %v1914_v39  ;;  %vm1913_vm13 = vcmp.eq.f32.partialorder %v1912_v40, 8.507059e+37 }
 0x965   :  { %v1891_v24 = vmul.f32 %v2280_v15, %v1890_v20  ;;  %v1856_v26 = vadd.f32 %v1841_v23, %v1709_v19 }
 0x967   :  { %v2282_v27 = vpop.eup %2281  ;;  %v1892_v28 = vadd.f32 %v2280_v15, %v1891_v24  ;;  %v2263_v29 = vmul.f32 -1.442695, %v1856_v26 }
 0x968   :  { %v2284_v30 = vpop.eup %2283  ;;  %v1883_v33 = vadd.f32 1.0, %v2282_v27 }
 0x969   :  { %v1896_v34 = vsel %vm1895_vm7, %v2280_v15, %v1892_v28  ;;  %v1904_v35 = vmul.f32 %v2284_v30, %v1882_v16  ;;  %2285 = vpow2.f32 %v2263_v29  ;;  %vm1909_vm10 = vweird.f32 %v2284_v30 }
 0x96a   :  { %v1901_v36 = vsel %vm1898_vm9, %v1900_v32, %v1896_v34  ;;  %2287 = vrcp.f32 %v1883_v33  ;;  %vm1910_vm12 = vmor %vm1908_vm11, %vm1909_vm10  ;;  %v1929_v0 = vand.u32 2147483648, %v1883_v33  ;;  %v1927_v41 = vand.u32 2147483647, %v1883_v33 }
 0x96b   :  { %1993 = vst.msk [vmem:[%s3407_s21] sm:$0xff] %vm641_vm8, %v1901_v36  ;;  %v1905_v38 = vsub.f32 1.0, %v1904_v35  ;;  %vm1923_vm15 = vweird.f32 %v1883_v33 }
 0x96c   :  { %v1844_v43 = vpop.f32.mrf.mxu3  ;;  %v1930_v10 = vor.u32 1.1754944e-38, %v1929_v0  ;;  %vm1928_vm2 = vcmp.eq.f32.partialorder %v1927_v41, 8.507059e+37 }
 0x96d   :  { %v1906_v44 = vmul.f32 %v2284_v30, %v1905_v38  ;;  %v1857_v45 = vadd.f32 %v1844_v43, %v1710_v37 }
 0x96f   :  { %v2286_v47 = vpop.eup %2285  ;;  %v1907_v48 = vadd.f32 %v2284_v30, %v1906_v44  ;;  %v2264_v49 = vmul.f32 -1.442695, %v1857_v45 }
 0x970   :  { %v2288_v50 = vpop.eup %2287  ;;  %v1884_v56 = vadd.f32 1.0, %v2286_v47 }
 0x971   :  { %v1911_v57 = vsel %vm1910_vm12, %v2284_v30, %v1907_v48  ;;  %v1919_v59 = vmul.f32 %v2288_v50, %v1883_v33  ;;  %2289 = vpow2.f32 %v2264_v49  ;;  %vm1924_vm14 = vweird.f32 %v2288_v50 }
 0x972   :  { %v1916_v61 = vsel %vm1913_vm13, %v1915_v53, %v1911_v57  ;;  %2291 = vrcp.f32 %v1884_v56  ;;  %vm1925_vm1 = vmor %vm1923_vm15, %vm1924_vm14  ;;  %v1944_v6 = vand.u32 2147483648, %v1884_v56  ;;  %v1942_v60 = vand.u32 2147483647, %v1884_v56 }
 0x973   :  { %1994 = vst.msk [vmem:[%s3407_s21 + $0x8] sm:$0xff] %vm641_vm8, %v1916_v61  ;;  %v1920_v63 = vsub.f32 1.0, %v1919_v59  ;;  %vm1938_vm4 = vweird.f32 %v1884_v56 }
 0x974   :  { %v1847_v1 = vpop.f32.mrf.mxu3  ;;  %v1945_v20 = vor.u32 1.1754944e-38, %v1944_v6  ;;  %vm1943_vm0 = vcmp.eq.f32.partialorder %v1942_v60, 8.507059e+37 }
 0x975   :  { %v1921_v2 = vmul.f32 %v2288_v50, %v1920_v63  ;;  %v1858_v58 = vadd.f32 %v1847_v1, %v1711_v62 }
 0x977   :  { %v2290_v3 = vpop.eup %2289  ;;  %v1922_v4 = vadd.f32 %v2288_v50, %v1921_v2  ;;  %v2265_v5 = vmul.f32 -1.442695, %v1858_v58 }
 0x978   :  { %v2292_v7 = vpop.eup %2291  ;;  %v1885_v11 = vadd.f32 1.0, %v2290_v3 }
 0x979   :  { %v1926_v12 = vsel %vm1925_vm1, %v2288_v50, %v1922_v4  ;;  %v1934_v13 = vmul.f32 %v2292_v7, %v1884_v56  ;;  %2293 = vpow2.f32 %v2265_v5  ;;  %vm1939_vm3 = vweird.f32 %v2292_v7 }
 0x97a   :  { %v1931_v55 = vsel %vm1928_vm2, %v1930_v10, %v1926_v12  ;;  %2295 = vrcp.f32 %v1885_v11  ;;  %vm1940_vm5 = vmor %vm1938_vm4, %vm1939_vm3  ;;  %v1959_v26 = vand.u32 2147483648, %v1885_v11  ;;  %v1957_v28 = vand.u32 2147483647, %v1885_v11 }
 0x97b   :  { %1995 = vst.msk [vmem:[%s3407_s21 + $0x10] sm:$0xff] %vm641_vm8, %v1931_v55  ;;  %v1935_v54 = vsub.f32 1.0, %v1934_v13  ;;  %vm1953_vm7 = vweird.f32 %v1885_v11 }
 0x97c   :  { %v1850_v14 = vpop.f32.mrf.mxu3  ;;  %v1960_v32 = vor.u32 1.1754944e-38, %v1959_v26  ;;  %vm1958_vm10 = vcmp.eq.f32.partialorder %v1957_v28, 8.507059e+37 }
 0x97d   :  { %v1936_v42 = vmul.f32 %v2292_v7, %v1935_v54  ;;  %v1859_v15 = vadd.f32 %v1850_v14, %v1712_v51 }
 0x97f   :  { %v2294_v16 = vpop.eup %2293  ;;  %v1937_v17 = vadd.f32 %v2292_v7, %v1936_v42  ;;  %v2266_v18 = vmul.f32 -1.442695, %v1859_v15 }
 0x980   :  { %v2296_v19 = vpop.eup %2295  ;;  %v1886_v21 = vadd.f32 1.0, %v2294_v16 }
 0x981   :  { %v1941_v22 = vsel %vm1940_vm5, %v2292_v7, %v1937_v17  ;;  %v1949_v23 = vmul.f32 %v2296_v19, %v1885_v11  ;;  %2297 = vpow2.f32 %v2266_v18  ;;  %vm1954_vm6 = vweird.f32 %v2296_v19 }
 0x982   :  { %v1946_v24 = vsel %vm1943_vm0, %v1945_v20, %v1941_v22  ;;  %2299 = vrcp.f32 %v1886_v21  ;;  %vm1955_vm9 = vmor %vm1953_vm7, %vm1954_vm6  ;;  %v1974_v38 = vand.u32 2147483648, %v1886_v21  ;;  %v1972_v43 = vand.u32 2147483647, %v1886_v21 }
 0x983   :  { %1996 = vst.msk [vmem:[%s3407_s21 + $0x18] sm:$0xff] %vm641_vm8, %v1946_v24  ;;  %v1950_v25 = vsub.f32 1.0, %v1949_v23  ;;  %vm1968_vm12 = vweird.f32 %v1886_v21 }
 0x984   :  { %v1975_v45 = vor.u32 1.1754944e-38, %v1974_v38  ;;  %vm1973_vm14 = vcmp.eq.f32.partialorder %v1972_v43, 8.507059e+37 }
 0x985   :  { %v1951_v27 = vmul.f32 %v2296_v19, %v1950_v25 }
 0x987   :  { %v2298_v29 = vpop.eup %2297  ;;  %v1952_v30 = vadd.f32 %v2296_v19, %v1951_v27 }
 0x988   :  { %v2300_v31 = vpop.eup %2299  ;;  %v1887_v33 = vadd.f32 1.0, %v2298_v29 }
 0x989   :  { %v1956_v34 = vsel %vm1955_vm9, %v2296_v19, %v1952_v30  ;;  %v1964_v35 = vmul.f32 %v2300_v31, %v1886_v21  ;;  %vm1969_vm11 = vweird.f32 %v2300_v31 }
 0x98a   :  { %v1961_v36 = vsel %vm1958_vm10, %v1960_v32, %v1956_v34  ;;  %2301 = vrcp.f32 %v1887_v33  ;;  %vm1970_vm13 = vmor %vm1968_vm12, %vm1969_vm11  ;;  %v1989_v50 = vand.u32 2147483648, %v1887_v33  ;;  %v1987_v53 = vand.u32 2147483647, %v1887_v33 }
 0x98b   :  { %1997 = vst.msk [vmem:[%s3407_s21 + $0x20] sm:$0xff] %vm641_vm8, %v1961_v36  ;;  %v1965_v37 = vsub.f32 1.0, %v1964_v35  ;;  %vm1983_vm1 = vweird.f32 %v1887_v33 }
 0x98c   :  { %v1990_v57 = vor.u32 1.1754944e-38, %v1989_v50  ;;  %vm1988_vm3 = vcmp.eq.f32.partialorder %v1987_v53, 8.507059e+37 }
 0x98d   :  { %v1966_v39 = vmul.f32 %v2300_v31, %v1965_v37 }
 0x98f   :  { %v1967_v44 = vadd.f32 %v2300_v31, %v1966_v39 }
 0x990   :  { %v2302_v40 = vpop.eup %2301 }
 0x991   :  { %v1971_v46 = vsel %vm1970_vm13, %v2300_v31, %v1967_v44  ;;  %v1979_v47 = vmul.f32 %v2302_v40, %v1887_v33  ;;  %vm1984_vm15 = vweird.f32 %v2302_v40 }
 0x992   :  { %v1976_v48 = vsel %vm1973_vm14, %v1975_v45, %v1971_v46  ;;  %vm1985_vm2 = vmor %vm1983_vm1, %vm1984_vm15 }
 0x993   :  { %1998 = vst.msk [vmem:[%s3407_s21 + $0x28] sm:$0xff] %vm641_vm8, %v1976_v48  ;;  %v1980_v49 = vsub.f32 1.0, %v1979_v47 }
 0x995   :  { %v1981_v52 = vmul.f32 %v2302_v40, %v1980_v49 }
 0x997   :  { %v1982_v56 = vadd.f32 %v2302_v40, %v1981_v52 }
 0x999   :  { %v1986_v59 = vsel %vm1985_vm2, %v2302_v40, %v1982_v56 }
 0x99a   :  { %v1991_v61 = vsel %vm1988_vm3, %v1990_v57, %v1986_v59 }
 0x99b   :  { %1999 = vst.msk [vmem:[%s3407_s21 + $0x30] sm:$0xff] %vm641_vm8, %v1991_v61 }

</bundles_post_ra>
